<compile_context>
chip_gen: v7x
topology: tpu7x:2x2x1
jax: 0.10.0
libtpu: 0.0.40
codegen_flags: <defaults>
</compile_context>

<pallas_src>
import functools
import numpy as np
import jax
import jax.numpy as jnp
from jax import lax
from jax.experimental import pallas as pl
from jax.experimental.pallas import tpu as pltpu

ALPHA = 0.2      # LeakyReLU negative slope
NEG = -1e30      # finite "masked" sentinel (exp underflows to exactly 0)
BIG = 1e30       # lse sentinel for lone / fully-masked rows -> attn row == 0


def _round_up(x, m):
    return (x + m - 1) // m * m


# ---------------------------------------------------------------------------
# Pass 1: per-row masked log-sum-exp, streamed over column tiles (flash-style).
# ---------------------------------------------------------------------------
def _row_stats_kernel(f1_ref, f2_ref, adj_ref, keep_ref, lse_ref, m_sc, l_sc):
    j = pl.program_id(1)

    @pl.when(j == 0)
    def _init():
        m_sc[...] = jnp.full_like(m_sc, NEG)
        l_sc[...] = jnp.zeros_like(l_sc)

    e = f1_ref[...] + f2_ref[...]                   # (tq, tk) raw scores
    e = jnp.maximum(e, ALPHA * e)                   # LeakyReLU (alpha < 1)
    e = jnp.where(adj_ref[...] != 0, e, NEG)        # mask non-edges (int8 adj)

    m_prev = m_sc[...]
    m_new = jnp.maximum(m_prev, jnp.max(e, axis=1, keepdims=True))
    p = jnp.exp(e - m_new)
    # Row sum on the MXU (frees the XLU lane-reduce slot).
    ones_col = jnp.ones((p.shape[1], 1), jnp.float32)
    l_sc[...] = (l_sc[...] * jnp.exp(m_prev - m_new)
                 + jnp.dot(p, ones_col, preferred_element_type=jnp.float32))
    m_sc[...] = m_new

    @pl.when(j == pl.num_programs(1) - 1)
    def _fin():
        lse = m_sc[...] + jnp.log(l_sc[...])
        # lone rows and fully-masked rows -> BIG so exp(x - BIG) == 0 downstream.
        valid = jnp.logical_and(keep_ref[...] > 0.0, m_sc[...] > -1e20)
        lse_ref[...] = jnp.where(valid, lse, BIG)


# ---------------------------------------------------------------------------
# Pass 2: normalized attention tiles + h' accumulation over column tiles.
# ---------------------------------------------------------------------------
def _attn_kernel(f1_ref, f2_ref, adj_ref, lse_ref, whc_ref, attn_ref, hp_ref,
                 *, use_bf16):
    j = pl.program_id(1)

    @pl.when(j == 0)
    def _init():
        hp_ref[...] = jnp.zeros_like(hp_ref)

    e = f1_ref[...] + f2_ref[...]
    e = jnp.maximum(e, ALPHA * e)
    e = jnp.where(adj_ref[...] != 0, e, NEG)
    attn = jnp.exp(e - lse_ref[...])                # softmax; lone rows -> 0
    attn_ref[...] = attn

    if use_bf16:
        hp_ref[...] += jnp.dot(attn.astype(jnp.bfloat16), whc_ref[...],
                               preferred_element_type=jnp.float32)
    else:
        hp_ref[...] += jnp.dot(attn, whc_ref[...],
                               preferred_element_type=jnp.float32)


# ---------------------------------------------------------------------------
# Wrapper
# ---------------------------------------------------------------------------
@functools.partial(jax.jit,
                   static_argnames=("tile", "use_bf16_matmul", "vmem_limit_bytes"))
def graph_attention_forward(h, adj, W, a, *, tile=512, use_bf16_matmul=False,
                            vmem_limit_bytes=48 * 1024 * 1024):
    """GAT forward. h: (N, F_in), adj: (N, N), W: (F_in, F_out), a: (2*F_out, 1).
    Returns (h_prime (N, F_out), final_attn (N, N)), both float32."""
    assert tile % 128 == 0
    f32 = jnp.float32
    h = h.astype(f32)
    W = W.astype(f32)
    a = a.astype(f32)
    N = h.shape[0]
    f_out = W.shape[1]

    # ---- hoisted prologue (XLA): Wh, fused score projection ----
    hi = lax.Precision.HIGHEST
    Wh = jnp.dot(h, W, precision=hi)                              # (N, F_out)
    a12 = jnp.concatenate([a[:f_out], a[f_out:]], axis=1)         # (F_out, 2)
    proj = jnp.dot(Wh, a12, precision=hi)                         # (N, 2) = [f1 | f2]

    # Single fused pass over adj: degree for the lone-node test + int8 edge mask.
    deg = jnp.sum(adj.astype(f32), axis=1)                        # (N,)
    adj_i8 = (adj != 0).astype(jnp.int8)                          # (N, N), 1 B/elem
    keep = deg != 1.0                                             # lone <=> degree == 1

    # fold keep masks into the projections: dropped rows/cols score -1e30.
    f1 = jnp.where(keep, proj[:, 0], NEG)[:, None]                # (N, 1)
    f2 = jnp.where(keep, proj[:, 1], NEG)[None, :]                # (1, N)
    keep_f = keep.astype(f32)[:, None]                            # (N, 1)

    # ---- tile selection (no O(N^2) padding; adj/attn stay (N, N)) ----
    if N <= 128:
        tq = tk = N
    else:
        # >= 2 row blocks so both v7x TensorCores get work; multiples of 128.
        tq = min(tile, max(128, _round_up(pl.cdiv(N, 2), 128)))
        tk = min(tile, (N // 128) * 128)
    nr = _round_up(N, tq)
    nc = _round_up(N, tk)

    # Pad only O(N) / O(N*F_out) operands so ragged adj/attn tails are inert.
    if nr > N:
        f1 = jnp.pad(f1, ((0, nr - N), (0, 0)), constant_values=NEG)
        keep_f = jnp.pad(keep_f, ((0, nr - N), (0, 0)))
    if nc > N:
        f2 = jnp.pad(f2, ((0, 0), (0, nc - N)), constant_values=NEG)
    Wh_c = Wh if nc == N else jnp.pad(Wh, ((0, nc - N), (0, 0)))
    if use_bf16_matmul:
        Wh_c = Wh_c.astype(jnp.bfloat16)

    grid = (pl.cdiv(N, tq), pl.cdiv(N, tk))
    cparams = pltpu.CompilerParams(
        dimension_semantics=("parallel", "arbitrary"),
        vmem_limit_bytes=vmem_limit_bytes)

    # ---- pass 1: per-row logsumexp over column tiles ----
    lse = pl.pallas_call(
        _row_stats_kernel,
        out_shape=jax.ShapeDtypeStruct((nr, 1), f32),
        grid=grid,
        in_specs=[
            pl.BlockSpec((tq, 1), lambda i, j: (i, 0)),      # f1 (keep-folded)
            pl.BlockSpec((1, tk), lambda i, j: (0, j)),      # f2 row (keep-folded)
            pl.BlockSpec((tq, tk), lambda i, j: (i, j)),     # adj tile (int8)
            pl.BlockSpec((tq, 1), lambda i, j: (i, 0)),      # keep flag (rows)
        ],
        out_specs=pl.BlockSpec((tq, 1), lambda i, j: (i, 0)),
        scratch_shapes=[pltpu.VMEM((tq, 1), f32), pltpu.VMEM((tq, 1), f32)],
        compiler_params=cparams,
    )(f1, f2, adj_i8, keep_f)

    # ---- pass 2: attention tiles + h' accumulation ----
    attn, h_prime = pl.pallas_call(
        functools.partial(_attn_kernel, use_bf16=use_bf16_matmul),
        out_shape=(jax.ShapeDtypeStruct((N, N), f32),
                   jax.ShapeDtypeStruct((N, f_out), f32)),
        grid=grid,
        in_specs=[
            pl.BlockSpec((tq, 1), lambda i, j: (i, 0)),      # f1
            pl.BlockSpec((1, tk), lambda i, j: (0, j)),      # f2 row
            pl.BlockSpec((tq, tk), lambda i, j: (i, j)),     # adj tile (int8)
            pl.BlockSpec((tq, 1), lambda i, j: (i, 0)),      # lse
            pl.BlockSpec((tk, f_out), lambda i, j: (j, 0)),  # Wh column block (RHS)
        ],
        out_specs=(
            pl.BlockSpec((tq, tk), lambda i, j: (i, j)),     # final_attn tile
            pl.BlockSpec((tq, f_out), lambda i, j: (i, 0)),  # h' (accumulated over j)
        ),
        compiler_params=cparams,
    )(f1, f2, adj_i8, lse, Wh_c)

    # ---- cheap O(N) epilogue (XLA): lone-row fallback + diagonal fix-up ----
    is_lone = jnp.logical_not(keep)
    h_prime = jnp.where(keep[:, None], h_prime, Wh)            # lone rows -> Wh row
    r = jnp.arange(N)
    attn = attn.at[r, r].add(is_lone.astype(f32))              # lone rows are all-0
    return h_prime, attn


# ---------------------------------------------------------------------------
# NumPy reference (PyTorch module, eval mode / no dropout)
# ---------------------------------------------------------------------------
def reference_forward(h, adj, W, a, alpha=ALPHA):
    h = np.asarray(h, np.float32)
    adj = np.asarray(adj, np.float32)
    W = np.asarray(W, np.float32)
    a = np.asarray(a, np.float32)
    Wh = h @ W
    is_lone = adj.sum(1) == 1
    keep = ~is_lone
    final_attn = np.zeros_like(adj)

    def edge_scores(Whk):
        n = Whk.shape[0]
        Wh1 = np.repeat(Whk[:, None, :], n, axis=1)
        Wh2 = np.repeat(Whk[None, :, :], n, axis=0)
        a_in = np.concatenate([Wh1, Wh2], axis=-1)
        s = (a_in @ a).squeeze(-1)
        return np.where(s > 0, s, alpha * s)

    if keep.any():
        Whk = Wh[keep]
        adjk = adj[keep][:, keep]
        e = edge_scores(Whk)
        em = np.where(adjk == 0, -np.inf, e)
        em = em - em.max(1, keepdims=True)
        p = np.exp(em)
        attn = p / p.sum(1, keepdims=True)
        h_prime = Wh.copy()
        h_prime[keep] = attn @ Whk
        idx = np.where(keep)[0]
        final_attn[np.ix_(idx, idx)] = attn
        idxl = np.where(is_lone)[0]
        final_attn[idxl, idxl] = 1.0
    else:
        e = edge_scores(Wh)
        em = np.where(adj == 0, -np.inf, e)
        em = em - em.max(1, keepdims=True)
        p = np.exp(em)
        attn = p / p.sum(1, keepdims=True)
        h_prime = attn @ Wh
        final_attn = attn
    return h_prime, final_attn


if __name__ == "__main__":
    N, F_IN, F_OUT = 256, 16, 16
    TILE = 128  # small tile so the demo exercises a real 2x2 grid
    key = jax.random.PRNGKey(0)
    k_h, k_adj, k_w, k_a = jax.random.split(key, 4)

    h = jax.random.normal(k_h, (N, F_IN), dtype=jnp.float32)

    # symmetric 0/1 adjacency with self-loops; force node 0 to be a lone node
    rnd = jax.random.bernoulli(k_adj, 0.1, (N, N))
    adj = jnp.logical_or(rnd, rnd.T).astype(jnp.float32)
    adj = adj.at[0, :].set(0.0).at[:, 0].set(0.0)
    adj = adj.at[jnp.arange(N), jnp.arange(N)].set(1.0)

    # deterministic xavier_uniform(gain=1.414) parameter init
    gain = 1.414
    bw = gain * np.sqrt(6.0 / (F_IN + F_OUT))
    W = jax.random.uniform(k_w, (F_IN, F_OUT), jnp.float32, -bw, bw)
    ba = gain * np.sqrt(6.0 / (2 * F_OUT + 1))
    a = jax.random.uniform(k_a, (2 * F_OUT, 1), jnp.float32, -ba, ba)

    # config 1: N divisible by the tile (2x2 grid, no partial blocks)
    h_prime, final_attn = graph_attention_forward(h, adj, W, a, tile=TILE)
    jax.block_until_ready((h_prime, final_attn))
    ref_hp, ref_attn = reference_forward(np.asarray(h), np.asarray(adj),
                                         np.asarray(W), np.asarray(a))
    np.testing.assert_allclose(np.asarray(h_prime), ref_hp, rtol=1e-4, atol=1e-5)
    np.testing.assert_allclose(np.asarray(final_attn), ref_attn, rtol=1e-4, atol=1e-5)

    # config 2: N not a multiple of the tile -> exercises partial blocks with
    # no O(N^2) padding of adj and no slicing of attn.
    N2 = 192
    h2, adj2 = h[:N2], adj[:N2, :N2]
    h_prime2, attn2 = graph_attention_forward(h2, adj2, W, a, tile=TILE)
    jax.block_until_ready((h_prime2, attn2))
    ref_hp2, ref_attn2 = reference_forward(np.asarray(h2), np.asarray(adj2),
                                           np.asarray(W), np.asarray(a))
    np.testing.assert_allclose(np.asarray(h_prime2), ref_hp2, rtol=1e-4, atol=1e-5)
    np.testing.assert_allclose(np.asarray(attn2), ref_attn2, rtol=1e-4, atol=1e-5)

    print("KERNEL_OK")
</pallas_src>

<mosaic_0001>
module attributes {stable_mosaic.version = 11 : i64} {
  func.func private @main(%arg0: i32) attributes {dimension_semantics = [#tpu.dimension_semantics<core_parallel>], iteration_bounds = array<i64: 2>, tpu.core_type = #tpu.core_type<sc_scalar_subcore>, window_params = []} {
    return
  }
}

module attributes {stable_mosaic.version = 11 : i64} {
  func.func private @main(%arg0: i32) attributes {dimension_semantics = [#tpu.dimension_semantics<core_parallel>], iteration_bounds = array<i64: 2>, tpu.core_type = #tpu.core_type<sc_scalar_subcore>, window_params = []} {
    return
  }
}

module attributes {stable_mosaic.version = 11 : i64} {
  func.func @_attn_kernel(%arg0: i32, %arg1: i32, %arg2: memref<128x1xf32, #tpu.memory_space<vmem>>, %arg3: memref<1x128xf32, #tpu.memory_space<vmem>>, %arg4: memref<128x128xi8, #tpu.memory_space<vmem>>, %arg5: memref<128x1xf32, #tpu.memory_space<vmem>>, %arg6: memref<128x16xf32, #tpu.memory_space<vmem>>, %arg7: memref<128x128xf32, #tpu.memory_space<vmem>>, %arg8: memref<128x16xf32, #tpu.memory_space<vmem>>) attributes {dimension_semantics = [#tpu.dimension_semantics<parallel>, #tpu.dimension_semantics<arbitrary>], iteration_bounds = array<i64: 2, 2>, scalar_prefetch = 0 : i64, scratch_operands = 0 : i64, tpu.core_type = #tpu.core_type<tc>, window_params = [{transform_indices = @transform_0, window_bounds = array<i64: 128, 1>}, {transform_indices = @transform_1, window_bounds = array<i64: 1, 128>}, {transform_indices = @transform_2, window_bounds = array<i64: 128, 128>}, {transform_indices = @transform_3, window_bounds = array<i64: 128, 1>}, {transform_indices = @transform_4, window_bounds = array<i64: 128, 16>}, {transform_indices = @transform_5, window_bounds = array<i64: 128, 128>}, {transform_indices = @transform_6, window_bounds = array<i64: 128, 16>}]} {
    %c0_i32 = arith.constant 0 : i32
    %0 = arith.cmpi eq, %arg1, %c0_i32 : i32
    %1 = arith.extui %0 : i1 to i32
    %c0_i32_0 = arith.constant 0 : i32
    %2 = arith.cmpi ne, %1, %c0_i32_0 : i32
    scf.if %2 {
      %cst_18 = arith.constant 0.000000e+00 : f32
      %26 = vector.broadcast %cst_18 : f32 to vector<128x16xf32>
      %c0_19 = arith.constant 0 : index
      %c0_20 = arith.constant 0 : index
      %27 = vector.load %arg8[%c0_19, %c0_20] : memref<128x16xf32, #tpu.memory_space<vmem>>, vector<128x16xf32>
      tpu.vector_store %arg8[%c0_19, %c0_20], %26 {strides = array<i32>} : memref<128x16xf32, #tpu.memory_space<vmem>>, vector<128x16xf32>,
    } else {
    }
    %c0 = arith.constant 0 : index
    %c0_1 = arith.constant 0 : index
    %3 = vector.load %arg2[%c0, %c0_1] : memref<128x1xf32, #tpu.memory_space<vmem>>, vector<128x1xf32>
    %c0_2 = arith.constant 0 : index
    %c0_3 = arith.constant 0 : index
    %4 = vector.load %arg3[%c0_2, %c0_3] : memref<1x128xf32, #tpu.memory_space<vmem>>, vector<1x128xf32>
    %5 = vector.broadcast %3 : vector<128x1xf32> to vector<128x128xf32>
    %6 = vector.broadcast %4 : vector<1x128xf32> to vector<128x128xf32>
    %7 = arith.addf %5, %6 : vector<128x128xf32>
    %cst = arith.constant 2.000000e-01 : f32
    %8 = vector.broadcast %cst : f32 to vector<128x128xf32>
    %9 = arith.mulf %8, %7 : vector<128x128xf32>
    %10 = arith.maximumf %7, %9 : vector<128x128xf32>
    %c0_4 = arith.constant 0 : index
    %c0_5 = arith.constant 0 : index
    %11 = vector.load %arg4[%c0_4, %c0_5] : memref<128x128xi8, #tpu.memory_space<vmem>>, vector<128x128xi8>
    %c0_i8 = arith.constant 0 : i8
    %12 = vector.broadcast %c0_i8 : i8 to vector<128x128xi8>
    %13 = arith.cmpi ne, %11, %12 : vector<128x128xi8>
    %cst_6 = arith.constant -1.000000e+30 : f32
    %14 = vector.broadcast %cst_6 : f32 to vector<128x128xf32>
    %15 = arith.select %13, %10, %14 : vector<128x128xi1>, vector<128x128xf32>
    %c0_7 = arith.constant 0 : index
    %c0_8 = arith.constant 0 : index
    %16 = vector.load %arg5[%c0_7, %c0_8] : memref<128x1xf32, #tpu.memory_space<vmem>>, vector<128x1xf32>
    %17 = vector.broadcast %16 : vector<128x1xf32> to vector<128x128xf32>
    %18 = arith.subf %15, %17 : vector<128x128xf32>
    %19 = math.exp %18 : vector<128x128xf32>
    %c0_9 = arith.constant 0 : index
    %c0_10 = arith.constant 0 : index
    %20 = vector.load %arg7[%c0_9, %c0_10] : memref<128x128xf32, #tpu.memory_space<vmem>>, vector<128x128xf32>
    tpu.vector_store %arg7[%c0_9, %c0_10], %19 {strides = array<i32>} : memref<128x128xf32, #tpu.memory_space<vmem>>, vector<128x128xf32>,
    %c0_11 = arith.constant 0 : index
    %c0_12 = arith.constant 0 : index
    %21 = vector.load %arg8[%c0_11, %c0_12] : memref<128x16xf32, #tpu.memory_space<vmem>>, vector<128x16xf32>
    %c0_13 = arith.constant 0 : index
    %c0_14 = arith.constant 0 : index
    %22 = vector.load %arg6[%c0_13, %c0_14] : memref<128x16xf32, #tpu.memory_space<vmem>>, vector<128x16xf32>
    %cst_15 = arith.constant dense<0.000000e+00> : vector<128x16xf32>
    %23 = tpu.matmul %19, %22, %cst_15 {dimension_numbers = #tpu.dot_dimension_numbers<[1], [0], [0], [1], [0, 0, 1, 1], [], []>} : vector<128x128xf32>, vector<128x16xf32>, vector<128x16xf32> -> vector<128x16xf32>
    %24 = arith.addf %21, %23 : vector<128x16xf32>
    %c0_16 = arith.constant 0 : index
    %c0_17 = arith.constant 0 : index
    %25 = vector.load %arg8[%c0_16, %c0_17] : memref<128x16xf32, #tpu.memory_space<vmem>>, vector<128x16xf32>
    tpu.vector_store %arg8[%c0_16, %c0_17], %24 {strides = array<i32>} : memref<128x16xf32, #tpu.memory_space<vmem>>, vector<128x16xf32>,
    return
  }
  func.func @transform_0(%arg0: i32, %arg1: i32) -> (i32, i32) {
    %c0_i32 = arith.constant 0 : i32
    %c0_i32_0 = arith.constant 0 : i32
    return %arg0, %c0_i32 : i32, i32
  }
  func.func @transform_1(%arg0: i32, %arg1: i32) -> (i32, i32) {
    %c0_i32 = arith.constant 0 : i32
    %c0_i32_0 = arith.constant 0 : i32
    return %c0_i32, %arg1 : i32, i32
  }
  func.func @transform_2(%arg0: i32, %arg1: i32) -> (i32, i32) {
    %c0_i32 = arith.constant 0 : i32
    return %arg0, %arg1 : i32, i32
  }
  func.func @transform_3(%arg0: i32, %arg1: i32) -> (i32, i32) {
    %c0_i32 = arith.constant 0 : i32
    %c0_i32_0 = arith.constant 0 : i32
    return %arg0, %c0_i32 : i32, i32
  }
  func.func @transform_4(%arg0: i32, %arg1: i32) -> (i32, i32) {
    %c0_i32 = arith.constant 0 : i32
    %c0_i32_0 = arith.constant 0 : i32
    return %arg1, %c0_i32 : i32, i32
  }
  func.func @transform_5(%arg0: i32, %arg1: i32) -> (i32, i32) {
    %c0_i32 = arith.constant 0 : i32
    return %arg0, %arg1 : i32, i32
  }
  func.func @transform_6(%arg0: i32, %arg1: i32) -> (i32, i32) {
    %c0_i32 = arith.constant 0 : i32
    %c0_i32_0 = arith.constant 0 : i32
    return %arg0, %c0_i32 : i32, i32
  }
}

module attributes {stable_mosaic.version = 11 : i64} {
  func.func @_row_stats_kernel(%arg0: i32, %arg1: i32, %arg2: memref<128x1xf32, #tpu.memory_space<vmem>>, %arg3: memref<1x128xf32, #tpu.memory_space<vmem>>, %arg4: memref<128x128xi8, #tpu.memory_space<vmem>>, %arg5: memref<128x1xf32, #tpu.memory_space<vmem>>, %arg6: memref<128x1xf32, #tpu.memory_space<vmem>>, %arg7: memref<128x1xf32, #tpu.memory_space<vmem>>, %arg8: memref<128x1xf32, #tpu.memory_space<vmem>>) attributes {dimension_semantics = [#tpu.dimension_semantics<parallel>, #tpu.dimension_semantics<arbitrary>], iteration_bounds = array<i64: 2, 2>, scalar_prefetch = 0 : i64, scratch_operands = 2 : i64, tpu.core_type = #tpu.core_type<tc>, window_params = [{transform_indices = @transform_0, window_bounds = array<i64: 128, 1>}, {transform_indices = @transform_1, window_bounds = array<i64: 1, 128>}, {transform_indices = @transform_2, window_bounds = array<i64: 128, 128>}, {transform_indices = @transform_3, window_bounds = array<i64: 128, 1>}, {transform_indices = @transform_4, window_bounds = array<i64: 128, 1>}]} {
    %c0_i32 = arith.constant 0 : i32
    %0 = arith.cmpi eq, %arg1, %c0_i32 : i32
    %1 = arith.extui %0 : i1 to i32
    %c0_i32_0 = arith.constant 0 : i32
    %2 = arith.cmpi ne, %1, %c0_i32_0 : i32
    scf.if %2 {
      %cst_19 = arith.constant -1.000000e+30 : f32
      %35 = vector.broadcast %cst_19 : f32 to vector<128x1xf32>
      %c0_20 = arith.constant 0 : index
      %c0_21 = arith.constant 0 : index
      %36 = vector.load %arg7[%c0_20, %c0_21] : memref<128x1xf32, #tpu.memory_space<vmem>>, vector<128x1xf32>
      tpu.vector_store %arg7[%c0_20, %c0_21], %35 {strides = array<i32>} : memref<128x1xf32, #tpu.memory_space<vmem>>, vector<128x1xf32>,
      %cst_22 = arith.constant 0.000000e+00 : f32
      %37 = vector.broadcast %cst_22 : f32 to vector<128x1xf32>
      %c0_23 = arith.constant 0 : index
      %c0_24 = arith.constant 0 : index
      %38 = vector.load %arg8[%c0_23, %c0_24] : memref<128x1xf32, #tpu.memory_space<vmem>>, vector<128x1xf32>
      tpu.vector_store %arg8[%c0_23, %c0_24], %37 {strides = array<i32>} : memref<128x1xf32, #tpu.memory_space<vmem>>, vector<128x1xf32>,
    } else {
    }
    %c0 = arith.constant 0 : index
    %c0_1 = arith.constant 0 : index
    %3 = vector.load %arg2[%c0, %c0_1] : memref<128x1xf32, #tpu.memory_space<vmem>>, vector<128x1xf32>
    %c0_2 = arith.constant 0 : index
    %c0_3 = arith.constant 0 : index
    %4 = vector.load %arg3[%c0_2, %c0_3] : memref<1x128xf32, #tpu.memory_space<vmem>>, vector<1x128xf32>
    %5 = vector.broadcast %3 : vector<128x1xf32> to vector<128x128xf32>
    %6 = vector.broadcast %4 : vector<1x128xf32> to vector<128x128xf32>
    %7 = arith.addf %5, %6 : vector<128x128xf32>
    %cst = arith.constant 2.000000e-01 : f32
    %8 = vector.broadcast %cst : f32 to vector<128x128xf32>
    %9 = arith.mulf %8, %7 : vector<128x128xf32>
    %10 = arith.maximumf %7, %9 : vector<128x128xf32>
    %c0_4 = arith.constant 0 : index
    %c0_5 = arith.constant 0 : index
    %11 = vector.load %arg4[%c0_4, %c0_5] : memref<128x128xi8, #tpu.memory_space<vmem>>, vector<128x128xi8>
    %c0_i8 = arith.constant 0 : i8
    %12 = vector.broadcast %c0_i8 : i8 to vector<128x128xi8>
    %13 = arith.cmpi ne, %11, %12 : vector<128x128xi8>
    %cst_6 = arith.constant -1.000000e+30 : f32
    %14 = vector.broadcast %cst_6 : f32 to vector<128x128xf32>
    %15 = arith.select %13, %10, %14 : vector<128x128xi1>, vector<128x128xf32>
    %c0_7 = arith.constant 0 : index
    %c0_8 = arith.constant 0 : index
    %16 = vector.load %arg7[%c0_7, %c0_8] : memref<128x1xf32, #tpu.memory_space<vmem>>, vector<128x1xf32>
    %cst_9 = arith.constant dense<0xFF800000> : vector<128xf32>
    %17 = vector.multi_reduction <maximumf>, %15, %cst_9 [1] : vector<128x128xf32> to vector<128xf32>
    %18 = vector.shape_cast %17 : vector<128xf32> to vector<128x1xf32>
    %19 = arith.maximumf %16, %18 : vector<128x1xf32>
    %20 = vector.broadcast %19 : vector<128x1xf32> to vector<128x128xf32>
    %21 = arith.subf %15, %20 : vector<128x128xf32>
    %22 = math.exp %21 : vector<128x128xf32>
    %cst_10 = arith.constant 1.000000e+00 : f32
    %23 = vector.broadcast %cst_10 : f32 to vector<128x1xf32>
    %c0_11 = arith.constant 0 : index
    %c0_12 = arith.constant 0 : index
    %24 = vector.load %arg8[%c0_11, %c0_12] : memref<128x1xf32, #tpu.memory_space<vmem>>, vector<128x1xf32>
    %25 = arith.subf %16, %19 : vector<128x1xf32>
    %26 = math.exp %25 : vector<128x1xf32>
    %27 = arith.mulf %24, %26 : vector<128x1xf32>
    %cst_13 = arith.constant dense<0.000000e+00> : vector<128x1xf32>
    %28 = tpu.matmul %22, %23, %cst_13 {dimension_numbers = #tpu.dot_dimension_numbers<[1], [0], [0], [1], [0, 0, 1, 1], [], []>} : vector<128x128xf32>, vector<128x1xf32>, vector<128x1xf32> -> vector<128x1xf32>
    %29 = arith.addf %27, %28 : vector<128x1xf32>
    %c0_14 = arith.constant 0 : index
    %c0_15 = arith.constant 0 : index
    %30 = vector.load %arg8[%c0_14, %c0_15] : memref<128x1xf32, #tpu.memory_space<vmem>>, vector<128x1xf32>
    tpu.vector_store %arg8[%c0_14, %c0_15], %29 {strides = array<i32>} : memref<128x1xf32, #tpu.memory_space<vmem>>, vector<128x1xf32>,
    %c0_16 = arith.constant 0 : index
    %c0_17 = arith.constant 0 : index
    %31 = vector.load %arg7[%c0_16, %c0_17] : memref<128x1xf32, #tpu.memory_space<vmem>>, vector<128x1xf32>
    tpu.vector_store %arg7[%c0_16, %c0_17], %19 {strides = array<i32>} : memref<128x1xf32, #tpu.memory_space<vmem>>, vector<128x1xf32>,
    %c1_i32 = arith.constant 1 : i32
    %32 = arith.cmpi eq, %arg1, %c1_i32 : i32
    %33 = arith.extui %32 : i1 to i32
    %c0_i32_18 = arith.constant 0 : i32
    %34 = arith.cmpi ne, %33, %c0_i32_18 : i32
    scf.if %34 {
      %c0_19 = arith.constant 0 : index
      %c0_20 = arith.constant 0 : index
      %35 = vector.load %arg7[%c0_19, %c0_20] : memref<128x1xf32, #tpu.memory_space<vmem>>, vector<128x1xf32>
      %c0_21 = arith.constant 0 : index
      %c0_22 = arith.constant 0 : index
      %36 = vector.load %arg8[%c0_21, %c0_22] : memref<128x1xf32, #tpu.memory_space<vmem>>, vector<128x1xf32>
      %37 = math.log %36 : vector<128x1xf32>
      %38 = arith.addf %35, %37 : vector<128x1xf32>
      %c0_23 = arith.constant 0 : index
      %c0_24 = arith.constant 0 : index
      %39 = vector.load %arg5[%c0_23, %c0_24] : memref<128x1xf32, #tpu.memory_space<vmem>>, vector<128x1xf32>
      %cst_25 = arith.constant 0.000000e+00 : f32
      %40 = vector.broadcast %cst_25 : f32 to vector<128x1xf32>
      %41 = arith.cmpf ogt, %39, %40 : vector<128x1xf32>
      %c0_26 = arith.constant 0 : index
      %c0_27 = arith.constant 0 : index
      %42 = vector.load %arg7[%c0_26, %c0_27] : memref<128x1xf32, #tpu.memory_space<vmem>>, vector<128x1xf32>
      %cst_28 = arith.constant -1.000000e+20 : f32
      %43 = vector.broadcast %cst_28 : f32 to vector<128x1xf32>
      %44 = arith.cmpf ogt, %42, %43 : vector<128x1xf32>
      %45 = arith.andi %41, %44 : vector<128x1xi1>
      %cst_29 = arith.constant 1.000000e+30 : f32
      %46 = vector.broadcast %cst_29 : f32 to vector<128x1xf32>
      %47 = arith.select %45, %38, %46 : vector<128x1xi1>, vector<128x1xf32>
      %c0_30 = arith.constant 0 : index
      %c0_31 = arith.constant 0 : index
      %48 = vector.load %arg6[%c0_30, %c0_31] : memref<128x1xf32, #tpu.memory_space<vmem>>, vector<128x1xf32>
      tpu.vector_store %arg6[%c0_30, %c0_31], %47 {strides = array<i32>} : memref<128x1xf32, #tpu.memory_space<vmem>>, vector<128x1xf32>,
    } else {
    }
    return
  }
  func.func @transform_0(%arg0: i32, %arg1: i32) -> (i32, i32) {
    %c0_i32 = arith.constant 0 : i32
    %c0_i32_0 = arith.constant 0 : i32
    return %arg0, %c0_i32 : i32, i32
  }
  func.func @transform_1(%arg0: i32, %arg1: i32) -> (i32, i32) {
    %c0_i32 = arith.constant 0 : i32
    %c0_i32_0 = arith.constant 0 : i32
    return %c0_i32, %arg1 : i32, i32
  }
  func.func @transform_2(%arg0: i32, %arg1: i32) -> (i32, i32) {
    %c0_i32 = arith.constant 0 : i32
    return %arg0, %arg1 : i32, i32
  }
  func.func @transform_3(%arg0: i32, %arg1: i32) -> (i32, i32) {
    %c0_i32 = arith.constant 0 : i32
    %c0_i32_0 = arith.constant 0 : i32
    return %arg0, %c0_i32 : i32, i32
  }
  func.func @transform_4(%arg0: i32, %arg1: i32) -> (i32, i32) {
    %c0_i32 = arith.constant 0 : i32
    %c0_i32_0 = arith.constant 0 : i32
    return %arg0, %c0_i32 : i32, i32
  }
}

</mosaic_0001>

<bundles_post_ra>
// kernel: graph_attention_forward.3
= control target key start
LH: loop header
LB: loop body
LE: loop exit
PB: predicated region body
PF: predicated region fallthrough
CT: control target
= control target key end

     0   :  { %s2206_s0 = inlined_call_operand.vmem [shape: f32[256,1], index: 0, kind: input, shape index: {}]   ;;  %s2207_s1 = inlined_call_operand.vmem [shape: f32[1,256], index: 1, kind: input, shape index: {}]   ;;  %s2208_s2 = inlined_call_operand.vmem [shape: s8[256,256], index: 2, kind: input, shape index: {}]   ;;  %s2209_s3 = inlined_call_operand.vmem [shape: f32[256,1], index: 3, kind: input, shape index: {}]   ;;  %s2210_s4 = inlined_call_operand.vmem [shape: f32[256,16], index: 4, kind: input, shape index: {}]   ;;  %s2211_s5 = inlined_call_operand.hbm [shape: f32[256,256], index: 5, kind: output, shape index: {0}]   ;;  %s2212_s6 = inlined_call_operand.vmem [shape: f32[256,16], index: 6, kind: output, shape index: {1}]  }
   0x1   :  { %2220 = sst [smem:[#allocation14_spill]] %s2206_s0 }
   0x2   :  { %2221 = sst [smem:[#allocation15_spill]] %s2208_s2 }
   0x3   :  { %12 = vsyncpa [#allocation4], 0 }
   0x4   :  { %14 = vsyncpa [#allocation4 + $0x1], 0  ;;  %s1685_s21 = smov 0   ;;  %s1687_s22 = smov 0  }
   0x5   :  { %s1689_s23 = smov 0   ;;  %s1691_s24 = smov 0  }
   0x6   :  { %s1693_s25 = smov 0   ;;  %s1695_s26 = smov 0  }
   0x7   :  { %s1697_s27 = smov 0   ;;  %s1699_s28 = smov 0  }
   0x8 LB: > { %2222 = sst [smem:[#allocation6_spill]] %s1618_s22  ;;  %s1273_s29 = sadd.s32 4294967295, %s1642_s28   ;;  %s1642_s28 = sphi %s1699_s28, %s20_s28   ;;  %s1638_s27 = sphi %s1697_s27, %s2274_s27   ;;  %s1634_s26 = sphi %s1695_s26, %s2273_s26   ;;  %s1630_s25 = sphi %s1693_s25, %s2272_s25   ;;  %s1626_s24 = sphi %s1691_s24, %s2271_s24   ;;  %s1622_s23 = sphi %s1689_s23, %s2270_s23   ;;  %s1618_s22 = sphi %s1687_s22, %s2269_s22   ;;  %s1614_s21 = sphi %s1685_s21, %s2268_s21  }
   0x9   : > { %2223 = sst [smem:[#allocation7_spill]] %s1622_s23  ;;  %s1274_s30 = sadd.s32 4294967294, %s1642_s28  }
   0xa   : > { %2224 = sst [smem:[#allocation8_spill]] %s1634_s26  ;;  %s29_s7 = sadd.s32 1, %s1634_s26 }
   0xb   : > { %2225 = sst [smem:[#allocation9_spill]] %s1638_s27  ;;  %p30_p0 = scmp.ge.s32.totalorder %s29_s7, 2 }
   0xc   : > { %s32_s8 = sadd.s32 1, %s1638_s27  ;;  %p100_p1 = scmp.ne.s32.totalorder %s1622_s23, %s1618_s22 }
   0xd   : > { %p101_p2 = scmp.eq.s32.totalorder %s1642_s28, 0  ;;  %s2276_s7 = smov (%p30_p0, %s29_s7), 0 }
   0xe   : > { %2226 = sst [smem:[#allocation10_spill]] %s2276_s7  ;;  %s2278_s8 = smov (!%p30_p0, %s32_s8), %s1638_s27 }
   0xf   : > { %s89_s9 = ssub.s32 %s1634_s26, %s2276_s7  ;;  %p1737_p3 = por %p101_p2, %p100_p1 }
  0x10   : > { %p34_p4 = scmp.ge.s32.totalorder %s2278_s8, 2  ;;  %p184_p5 = scmp.eq.s32.totalorder %s1273_s29, 3 }
  0x11   : > { %p189_p6 = scmp.ne.s32.totalorder %s1618_s22, %s1614_s21  ;;  %p190_p7 = scmp.eq.s32.totalorder %s1274_s30, 3 }
  0x12   : > { %s2280_s8 = smov (%p34_p4, %s2278_s8), 0  ;;  %p1745_p8 = por %p184_p5, %p100_p1 }
  0x13   : > { %2228 = sst [smem:[#allocation11_spill]] %s2280_s8  ;;  %p1749_p9 = por %p190_p7, %p189_p6 }
  0x14   : > { %s88_s13 = ssub.s32 %s1638_s27, %s2280_s8  ;;  %s93_s15 = sadd.s32 1, %s1622_s23 }
  0x15   : > { %s2230_s12 = scalar_select %p1749_p9, 1, 0 }
  0x16   : > { %s90_s14 = sor.u32 %s89_s9, %s88_s13  ;;  %p1276_p11 = scmp.ge.s32.totalorder %s1642_s28, 4 }
  0x17   : > { %2231 = sst [smem:[#allocation12_spill]] %s2230_s12  ;;  %p91_p10 = scmp.eq.s32.totalorder %s90_s14, 0 }
  0x18   : > { %232 = sbr.rel (%p1276_p11) target bundleno = 43 (0x2b), region = 16 }
  0x19   : > { %s1757_s16 = scalar_select %p91_p10, %s1622_s23, %s93_s15  }
  0x1b   : > { %2232 = sst [smem:[#allocation13_spill]] %s1757_s16 }
  0x1f   : > { %250 = sbr.rel (!%p1737_p3) target bundleno = 43 (0x2b), region = 28  ;;  %s252_s17 = sand.u32 (%p1737_p3), 1, %s1622_s23  }
  0x20   : > { %s1300_s18 = sshll.u32 (%p1737_p3), %s1638_s27, 3  ;;  %s1277_s19 = sshll.u32 (%p1737_p3), %s252_s17, 5 }
  0x21   : > { %s257_s20 = sadd.s32 (%p1737_p3), %s1634_s26, %s1300_s18  ;;  %s2233_s2 = sld [smem:[#allocation15_spill]] (%p1737_p3) }
  0x22   : > { %s1280_s29 = sshll.u32 (%p1737_p3), %s257_s20, 3  ;;  %s254_s14 = scalar_lea.vmem (%p1737_p3), [#allocation2], %s1277_s19 }
  0x27   : > { %s259_s13 = scalar_lea.vmem %s2233_s2, %s1280_s29 }
  0x28   : > { %v293_v0 = vld [vmem:[%s259_s13] sm:$0xff]  ;;  %v295_v1 = vld [vmem:[%s259_s13 + $0x10] sm:$0xff] }
  0x29   : > { %v297_v2 = vld [vmem:[%s259_s13 + $0x20] sm:$0xff]  ;;  %294 = vst [vmem:[%s254_s14] sm:$0xff] %v293_v0  ;;  %296 = vst [vmem:[%s254_s14 + $0x8] sm:$0xff] %v295_v1  ;;  %v299_v3 = vld [vmem:[%s259_s13 + $0x30] sm:$0xff] }
  0x2a   : > { %298 = vst [vmem:[%s254_s14 + $0x10] sm:$0xff] %v297_v2  ;;  %300 = vst [vmem:[%s254_s14 + $0x18] sm:$0xff] %v299_v3 }
  0x2b PF: > { %p1281_p12 = scmp.ge.s32.totalorder %s1642_s28, 1  ;;  %p323_p13 = scmp.lt.s32.totalorder %s1642_s28, 5 }
  0x2d   : > { %p324_p0 = pnand %p1281_p12, %p323_p13 }
  0x2e   : > { %s1771_s10 = sand.u32 (!%p324_p0), 1, %s1618_s22   ;;  %s1284_s15 = sshll.u32 (!%p324_p0), %s1630_s25, 4 }
  0x2f   : > { %327 = sbr.rel (%p324_p0) target bundleno = 489 (0x1e9), region = 74  ;;  %s1282_s17 = sshll.u32 (!%p324_p0), %s1771_s10, 5 }
  0x30   : > { %s1283_s18 = sshll.u32 (!%p324_p0), %s1771_s10, 7  ;;  %p383_p1 = scmp.lt.s32.totalorder (!%p324_p0), %s1284_s15, 31 }
  0x31   : > { %p388_p2 = scmp.lt.s32.totalorder (!%p324_p0), %s1626_s24, 1  ;;  %s1288_s19 = sshll.u32 (!%p324_p0), %s1626_s24, 4 }
  0x32   : > { %p399_p3 = scmp.lt.s32.totalorder (!%p324_p0), %s1288_s19, 31  ;;  %s2234_s0 = sld [smem:[#allocation14_spill]] (!%p324_p0) }
  0x33   : > { %s1807_s2 = scalar_lea.vmem (!%p324_p0), [#allocation3], %s1283_s18  ;;  %p1292_p4 = scmp.ne.s32.totalorder (!%p324_p0), %s1626_s24, 0 }
  0x36   : > { %s2282_s15 = smov (!%p383_p1, %s1284_s15), 31  ;;  %s2284_s19 = smov (!%p399_p3, %s1288_s19), 31 }
  0x37   : > { %s1779_s20 = scalar_select %p388_p2, %s1626_s24, 1 }
  0x38   : > { %s1285_s29 = sshll.u32 %s2282_s15, 3  ;;  %s1289_s15 = sshll.u32 %s2284_s19, 3  ;;  %vm417_vm0 = vcmask (!%p1292_p4), 130048   ;;  %v1644_v4 = vmov (!%p1292_p4), 0.0  }
  0x39   : > { %s1784_s13 = scalar_lea.vmem %s2234_s0, %s1285_s29  ;;  %s390_s8 = scalar_lea.vmem %s2207_s1, %s1779_s20 }
  0x3a   : > { %s1793_s26 = scalar_lea.vmem %s2209_s3, %s1285_s29  ;;  %s1798_s22 = scalar_lea.vmem %s2212_s6, %s1285_s29 }
  0x3b   : > { %s1803_s9 = scalar_lea.vmem %s2210_s4, %s1289_s15  ;;  %s1805_s0 = scalar_lea.vmem [#allocation2], %s1282_s17  ;;  %418 = vst.msk [vmem:[%s1798_s22] sm:$0xff] (!%p1292_p4), %vm417_vm0, %v1644_v4  ;;  %419 = vst.msk [vmem:[%s1798_s22 + $0x8] sm:$0xff] (!%p1292_p4), %vm417_vm0, %v1644_v4 }
  0x3c   : > { %416 = sbr.rel (%p1292_p4) target bundleno = 67 (0x43), region = 82  ;;  %420 = vst.msk [vmem:[%s1798_s22 + $0x10] sm:$0xff] (!%p1292_p4), %vm417_vm0, %v1644_v4  ;;  %421 = vst.msk [vmem:[%s1798_s22 + $0x18] sm:$0xff] (!%p1292_p4), %vm417_vm0, %v1644_v4 }
  0x3d   : > { %422 = vst.msk [vmem:[%s1798_s22 + $0x20] sm:$0xff] (!%p1292_p4), %vm417_vm0, %v1644_v4  ;;  %423 = vst.msk [vmem:[%s1798_s22 + $0x28] sm:$0xff] (!%p1292_p4), %vm417_vm0, %v1644_v4 }
  0x3e   : > { %424 = vst.msk [vmem:[%s1798_s22 + $0x30] sm:$0xff] (!%p1292_p4), %vm417_vm0, %v1644_v4  ;;  %425 = vst.msk [vmem:[%s1798_s22 + $0x38] sm:$0xff] (!%p1292_p4), %vm417_vm0, %v1644_v4 }
  0x3f   : > { %426 = vst.msk [vmem:[%s1798_s22 + $0x40] sm:$0xff] (!%p1292_p4), %vm417_vm0, %v1644_v4  ;;  %427 = vst.msk [vmem:[%s1798_s22 + $0x48] sm:$0xff] (!%p1292_p4), %vm417_vm0, %v1644_v4 }
  0x40   : > { %428 = vst.msk [vmem:[%s1798_s22 + $0x50] sm:$0xff] (!%p1292_p4), %vm417_vm0, %v1644_v4  ;;  %429 = vst.msk [vmem:[%s1798_s22 + $0x58] sm:$0xff] (!%p1292_p4), %vm417_vm0, %v1644_v4 }
  0x41   : > { %430 = vst.msk [vmem:[%s1798_s22 + $0x60] sm:$0xff] (!%p1292_p4), %vm417_vm0, %v1644_v4  ;;  %431 = vst.msk [vmem:[%s1798_s22 + $0x68] sm:$0xff] (!%p1292_p4), %vm417_vm0, %v1644_v4 }
  0x42   : > { %432 = vst.msk [vmem:[%s1798_s22 + $0x70] sm:$0xff] (!%p1292_p4), %vm417_vm0, %v1644_v4  ;;  %433 = vst.msk [vmem:[%s1798_s22 + $0x78] sm:$0xff] (!%p1292_p4), %vm417_vm0, %v1644_v4 }
  0x43 PF: > { %v435_v5 = vld [vmem:[%s1784_s13 + $0x8] sm:$0xff]  ;;  %v434_v6 = vld [vmem:[%s1784_s13] sm:$0xff]  ;;  %v1645_v7 = vmov 0   ;;  %v444_v10 = vld [vmem:[%s1784_s13 + $0x50] sm:$0xff]  ;;  %s1096_s18 = scalar_lea.sflag [#allocation4], %s1771_s10 }
  0x44   : > { %1515 = vset.pattern.permute.xlu1 %v1645_v7  ;;  %1514 = vset.pattern.permute.xlu0 %v1645_v7  ;;  %v443_v8 = vld [vmem:[%s1784_s13 + $0x48] sm:$0xff]  ;;  %v442_v9 = vld [vmem:[%s1784_s13 + $0x40] sm:$0xff]  ;;  %v436_v11 = vld [vmem:[%s1784_s13 + $0x10] sm:$0xff] }
  0x45   : > { %458 = vperm.xlu1 %1515, %v435_v5   ;;  %453 = vperm.xlu0 %1514, %v434_v6   ;;  %v445_v12 = vld [vmem:[%s1784_s13 + $0x58] sm:$0xff]  ;;  %v901_v14 = vld [vmem:[%s1803_s9] sm:$0xff]  ;;  %v902_v15 = vld [vmem:[%s1803_s9 + $0x8] sm:$0xff] }
  0x46   : > { %v437_v13 = vld [vmem:[%s1784_s13 + $0x18] sm:$0xff]  ;;  %v903_v16 = vld [vmem:[%s1803_s9 + $0x10] sm:$0xff]  ;;  %v1390_v17 = vpack.c.bf16 %v902_v15, %v901_v14  ;;  %v905_v20 = vld [vmem:[%s1803_s9 + $0x20] sm:$0xff] }
  0x47   : > { %v904_v18 = vld [vmem:[%s1803_s9 + $0x18] sm:$0xff]  ;;  %v906_v21 = vld [vmem:[%s1803_s9 + $0x28] sm:$0xff]  ;;  %v733_v22 = vld [vmem:[%s1793_s26 + $0x40] sm:$0xff] }
  0x48   : > { %v1394_v19 = vpack.c.bf16 %v904_v18, %v903_v16  ;;  %v725_v23 = vld [vmem:[%s1793_s26] sm:$0xff]  ;;  %1391 = vmatprep.subr.bf16.mxu0 %v1390_v17  ;;  %1422 = vmatprep.subr.bf16.mxu1 %v1390_v17  ;;  %v1398_v24 = vpack.c.bf16 %v906_v21, %v905_v20  ;;  %v907_v27 = vld [vmem:[%s1803_s9 + $0x30] sm:$0xff]  ;;  %v908_v28 = vld [vmem:[%s1803_s9 + $0x38] sm:$0xff] }
  0x49   : > { %498 = vperm.xlu1 %1515, %v443_v8   ;;  %493 = vperm.xlu0 %1514, %v442_v9   ;;  %v446_v25 = vld [vmem:[%s1784_s13 + $0x60] sm:$0xff]  ;;  %v1402_v29 = vpack.c.bf16 %v908_v28, %v907_v27  ;;  %v734_v30 = vld [vmem:[%s1793_s26 + $0x48] sm:$0xff]  ;;  %v911_v37 = vld [vmem:[%s1803_s9 + $0x50] sm:$0xff] }
  0x4a   : > { %1393 = vmatpush3.bf16.msra.mxu0 %v1390_v17  ;;  %1430 = vmatpush3.bf16.msra.mxu1 %v1390_v17  ;;  %v438_v26 = vld [vmem:[%s1784_s13 + $0x20] sm:$0xff]  ;;  %v726_v31 = vld [vmem:[%s1793_s26 + $0x8] sm:$0xff]  ;;  %v912_v38 = vld [vmem:[%s1803_s9 + $0x58] sm:$0xff] }
  0x4b   : > { %1395 = vmatprep.subr.bf16.mxu0 %v1394_v19  ;;  %1423 = vmatprep.subr.bf16.mxu1 %v1394_v19  ;;  %v909_v32 = vld [vmem:[%s1803_s9 + $0x40] sm:$0xff]  ;;  %v910_v33 = vld [vmem:[%s1803_s9 + $0x48] sm:$0xff]  ;;  %v1410_v39 = vpack.c.bf16 %v912_v38, %v911_v37  ;;  %v735_v40 = vld [vmem:[%s1793_s26 + $0x50] sm:$0xff] }
  0x4c   : > { %v1406_v34 = vpack.c.bf16 %v910_v33, %v909_v32  ;;  %v447_v35 = vld [vmem:[%s1784_s13 + $0x68] sm:$0xff]  ;;  %v727_v41 = vld [vmem:[%s1793_s26 + $0x10] sm:$0xff]  ;;  %v913_v42 = vld [vmem:[%s1803_s9 + $0x60] sm:$0xff] }
  0x4d   : > { %503 = vperm.xlu1 %1515, %v444_v10   ;;  %463 = vperm.xlu0 %1514, %v436_v11   ;;  %v439_v36 = vld [vmem:[%s1784_s13 + $0x28] sm:$0xff]  ;;  %v448_v45 = vld [vmem:[%s1784_s13 + $0x70] sm:$0xff]  ;;  %v916_v48 = vld [vmem:[%s1803_s9 + $0x78] sm:$0xff] }
  0x4e   : > { %1397 = vmatpush3.bf16.msra.mxu0 %v1394_v19  ;;  %1431 = vmatpush3.bf16.msra.mxu1 %v1394_v19  ;;  %v914_v43 = vld [vmem:[%s1803_s9 + $0x68] sm:$0xff]  ;;  %v440_v46 = vld [vmem:[%s1784_s13 + $0x30] sm:$0xff]  ;;  %v736_v50 = vld [vmem:[%s1793_s26 + $0x58] sm:$0xff] }
  0x4f   : > { %1399 = vmatprep.subr.bf16.mxu0 %v1398_v24  ;;  %1424 = vmatprep.subr.bf16.mxu1 %v1398_v24  ;;  %v1414_v44 = vpack.c.bf16 %v914_v43, %v913_v42  ;;  %v915_v47 = vld [vmem:[%s1803_s9 + $0x70] sm:$0xff]  ;;  %v728_v51 = vld [vmem:[%s1793_s26 + $0x18] sm:$0xff]  ;;  %v737_v54 = vld [vmem:[%s1793_s26 + $0x60] sm:$0xff] }
  0x50   : > { %v1418_v49 = vpack.c.bf16 %v916_v48, %v915_v47  ;;  %v449_v52 = vld [vmem:[%s1784_s13 + $0x78] sm:$0xff]  ;;  %v729_v55 = vld [vmem:[%s1793_s26 + $0x20] sm:$0xff]  ;;  %v738_v56 = vld [vmem:[%s1793_s26 + $0x68] sm:$0xff] }
  0x51   : > { %508 = vperm.xlu1 %1515, %v445_v12   ;;  %468 = vperm.xlu0 %1514, %v437_v13   ;;  %v441_v53 = vld [vmem:[%s1784_s13 + $0x38] sm:$0xff]  ;;  %v730_v57 = vld [vmem:[%s1793_s26 + $0x28] sm:$0xff]  ;;  %v739_v58 = vld [vmem:[%s1793_s26 + $0x70] sm:$0xff] }
  0x52   : > { %1401 = vmatpush3.bf16.msra.mxu0 %v1398_v24  ;;  %1432 = vmatpush3.bf16.msra.mxu1 %v1398_v24  ;;  %v731_v59 = vld [vmem:[%s1793_s26 + $0x30] sm:$0xff]  ;;  %v740_v60 = vld [vmem:[%s1793_s26 + $0x78] sm:$0xff]  ;;  %v585_v63 = vld [vmem:[%s1805_s0] sm:$0xff] }
  0x53   : > { %1403 = vmatprep.subr.bf16.mxu0 %v1402_v29  ;;  %1425 = vmatprep.subr.bf16.mxu1 %v1402_v29  ;;  %v732_v61 = vld [vmem:[%s1793_s26 + $0x38] sm:$0xff]  ;;  %v587_v62 = vld [vmem:[%s1805_s0 + $0x10] sm:$0xff]  ;;  %vm589_vm2 = vnez %v585_v63  ;;  %v1901_v15 = vld [vmem:[%s390_s8] ss:$0 sm:$0xff]  ;;  %s1116_s8 = sshll.u32 %s1807_s2, 4  ;;  %s2104_s8 = int_to_ptr.vmem [resolvable:$true] %s1116_s8 }
  0x54   : > { %vm591_vm1 = vnez %v587_v62  ;;  %v593_v1 = vsel %vm589_vm2, 16843009, %v1645_v7  ;;  %v586_v38 = vld [vmem:[%s1805_s0 + $0x8] sm:$0xff]  ;;  %s1548_s19 = scalar_lea.vmem %s2104_s8, 2048 }
  0x55   : > { %783 = vperm.xlu1 %1515, %v733_v22   ;;  %743 = vperm.xlu0 %1514, %v725_v23   ;;  %v595_v0 = vsel %vm591_vm1, 16843009, %v1645_v7  ;;  %v597_v3 = vunpack.c.0.s8 %v593_v1  ;;  %v598_v6 = vunpack.c.1.s8 %v593_v1  ;;  %v599_v17 = vunpack.c.2.s8 %v593_v1  ;;  %v588_v23 = vld [vmem:[%s1805_s0 + $0x18] sm:$0xff]  ;;  %s1301_s0 = sshll.u32 %s1630_s25, 5  ;;  %p1549_p5 = scmp.ne.s32.totalorder %s2104_s8, %s1548_s19 }
  0x56   : > { %1405 = vmatpush3.bf16.msra.mxu0 %v1402_v29  ;;  %1433 = vmatpush3.bf16.msra.mxu1 %v1402_v29  ;;  %v605_v2 = vunpack.c.0.s8 %v595_v0  ;;  %v606_v8 = vunpack.c.1.s8 %v595_v0  ;;  %v607_v11 = vunpack.c.2.s8 %v595_v0  ;;  %vm592_vm5 = vnez %v588_v23  ;;  %s1113_s27 = sadd.s32 %s1626_s24, %s1301_s0  ;;  %s1646_s25 = smov [#allocation3]  }
  0x57   : > { %1407 = vmatprep.subr.bf16.mxu0 %v1406_v34  ;;  %1426 = vmatprep.subr.bf16.mxu1 %v1406_v34  ;;  %v613_v5 = vpack.c.b16 %v597_v3, %v597_v3  ;;  %v615_v14 = vpack.c.b16 %v598_v6, %v598_v6  ;;  %v617_v29 = vpack.c.b16 %v599_v17, %v599_v17  ;;  %v1914_v42 = vsel %vm592_vm5, 16843009, %v1645_v7  ;;  %s1297_s7 = sshll.u32 %s1113_s27, 7  ;;  %p1550_p6 = pnand %p1549_p5, %p1745_p8 }
  0x58   : > { %v629_v4 = vpack.c.b16 %v605_v2, %v605_v2  ;;  %v631_v16 = vpack.c.b16 %v606_v8, %v606_v8  ;;  %v633_v18 = vpack.c.b16 %v607_v11, %v607_v11  ;;  %vm590_vm9 = vnez %v586_v38  ;;  %s2102_s17 = scalar_lea.hbm %s2211_s5, %s1297_s7  ;;  %s1552_s24 = sshll.u32 %s1646_s25, 4  ;;  %s1553_s24 = int_to_ptr.vmem [resolvable:$false] %s1552_s24 }
  0x59   : > { %513 = vperm.xlu1 %1515, %v446_v25   ;;  %473 = vperm.xlu0 %1514, %v438_v26   ;;  %v614_v10 = vpack.c.b8 %v613_v5, %v613_v5  ;;  %v616_v22 = vpack.c.b8 %v615_v14, %v615_v14  ;;  %v608_v25 = vunpack.c.3.s8 %v595_v0  ;;  %p1551_p7 = pneg %p1550_p6  ;;  %s1554_s20 = scalar_lea.vmem %s1553_s24, 4096 }
  0x5a   : > { %1409 = vmatpush3.bf16.msra.mxu0 %v1406_v34  ;;  %1434 = vmatpush3.bf16.msra.mxu1 %v1406_v34  ;;  %v630_v9 = vpack.c.b8 %v629_v4, %v629_v4  ;;  %v632_v28 = vpack.c.b8 %v631_v16, %v631_v16  ;;  %p1555_p10 = scmp.lt.s32.totalorder %s2104_s8, %s1553_s24  ;;  %p1556_p11 = scmp.lt.s32.totalorder %s1554_s20, %s1548_s19 }
  0x5b   : > { %1411 = vmatprep.subr.bf16.mxu0 %v1410_v39  ;;  %1427 = vmatprep.subr.bf16.mxu1 %v1410_v39  ;;  %vm645_vm4 = vnez %v614_v10  ;;  %vm646_vm6 = vnez %v616_v22 }
  0x5c   : > { %vm653_vm3 = vnez %v630_v9  ;;  %v661_v27 = vsel %vm645_vm4, 16843009, %v1645_v7  ;;  %vm1909_vm7 = vnez %v632_v28  ;;  %p1557_p12 = por %p1556_p11, %p1555_p10 }
  0x5d   : > { %788 = vperm.xlu1 %1515, %v734_v30   ;;  %748 = vperm.xlu0 %1514, %v726_v31   ;;  %v669_v26 = vsel %vm653_vm3, 16843009, %v1645_v7  ;;  %v634_v30 = vpack.c.b8 %v633_v18, %v633_v18  ;;  %v600_v31 = vunpack.c.3.s8 %v593_v1  ;;  %v677_v37 = vunpack.c.0.s8 %v661_v27 }
  0x5e   : > { %1413 = vmatpush3.bf16.msra.mxu0 %v1410_v39  ;;  %1435 = vmatpush3.bf16.msra.mxu1 %v1410_v39  ;;  %p1558_p13 = pnand %p1557_p12, %p1551_p7 }
  0x5f   : > { %1415 = vmatprep.subr.bf16.mxu0 %v1414_v44  ;;  %1428 = vmatprep.subr.bf16.mxu1 %v1414_v44  ;;  %vm655_vm8 = vnez %v634_v30  ;;  %vm693_vm11 = vcmp.ne.s32.totalorder %v677_v37, 0 }
  0x61   : > { %518 = vperm.xlu1 %1515, %v447_v35   ;;  %478 = vperm.xlu0 %1514, %v439_v36   ;;  %v685_v36 = vunpack.c.0.s8 %v669_v26 }
  0x62   : > { %1417 = vmatpush3.bf16.msra.mxu0 %v1414_v44  ;;  %1436 = vmatpush3.bf16.msra.mxu1 %v1414_v44  ;;  %v662_v44 = vsel %vm646_vm6, 16843009, %v1645_v7 }
  0x63   : > { %1419 = vmatprep.subr.bf16.mxu0 %v1418_v49  ;;  %1429 = vmatprep.subr.bf16.mxu1 %v1418_v49  ;;  %vm701_vm10 = vcmp.ne.s32.totalorder %v685_v36, 0 }
  0x65   : > { %793 = vperm.xlu1 %1515, %v735_v40   ;;  %753 = vperm.xlu0 %1514, %v727_v41   ;;  %v618_v40 = vpack.c.b8 %v617_v29, %v617_v29  ;;  %v635_v41 = vpack.c.b16 %v608_v25, %v608_v25 }
  0x66   : > { %1421 = vmatpush3.bf16.msra.mxu0 %v1418_v49  ;;  %1437 = vmatpush3.bf16.msra.mxu1 %v1418_v49 }
  0x67   : > { %vm647_vm12 = vnez %v618_v40 }
  0x68   : > { %v663_v6 = vsel %vm647_vm12, 16843009, %v1645_v7 }
  0x69   : > { %523 = vperm.xlu1 %1515, %v448_v45   ;;  %483 = vperm.xlu0 %1514, %v440_v46   ;;  %v619_v45 = vpack.c.b16 %v600_v31, %v600_v31 }
  0x6b   : > { %v620_v63 = vpack.c.b8 %v619_v45, %v619_v45 }
  0x6d   : > { %798 = vperm.xlu1 %1515, %v736_v50   ;;  %758 = vperm.xlu0 %1514, %v728_v51   ;;  %v609_v51 = vunpack.c.0.s8 %v1914_v42  ;;  %vm648_vm15 = vnez %v620_v63 }
  0x6e   : > { %v664_v26 = vsel %vm648_vm15, 16843009, %v1645_v7 }
  0x6f   : > { %v637_v3 = vpack.c.b16 %v609_v51, %v609_v51  ;;  %v680_v37 = vunpack.c.0.s8 %v664_v26 }
  0x71   : > { %528 = vperm.xlu1 %1515, %v449_v52   ;;  %488 = vperm.xlu0 %1514, %v441_v53   ;;  %v670_v52 = vsel %vm1909_vm7, 16843009, %v1645_v7  ;;  %v678_v53 = vunpack.c.0.s8 %v662_v44  ;;  %vm1976_vm5 = vcmp.ne.s32.totalorder %v680_v37, 0 }
  0x72   : > { %v686_v2 = vunpack.c.0.s8 %v670_v52 }
  0x73   : > { %vm1929_vm13 = vcmp.ne.s32.totalorder %v678_v53, 0 }
  0x74   : > { %vm702_vm0 = vcmp.ne.s32.totalorder %v686_v2, 0 }
  0x75   : > { %803 = vperm.xlu1 %1515, %v737_v54   ;;  %763 = vperm.xlu0 %1514, %v729_v55   ;;  %v636_v54 = vpack.c.b8 %v635_v41, %v635_v41 }
  0x77   : > { %vm1934_vm14 = vnez %v636_v54 }
  0x78   : > { %v672_v25 = vsel %vm1934_vm14, 16843009, %v1645_v7 }
  0x79   : > { %808 = vperm.xlu1 %1515, %v738_v56   ;;  %768 = vperm.xlu0 %1514, %v730_v57   ;;  %v671_v56 = vsel %vm655_vm8, 16843009, %v1645_v7  ;;  %v1927_v57 = vsel %vm590_vm9, 16843009, %v1645_v7  ;;  %v688_v36 = vunpack.c.0.s8 %v672_v25 }
  0x7a   : > { %v687_v5 = vunpack.c.0.s8 %v671_v56  ;;  %v602_v22 = vunpack.c.1.s8 %v1927_v57  ;;  %v603_v44 = vunpack.c.2.s8 %v1927_v57 }
  0x7b   : > { %vm1971_vm4 = vcmp.ne.s32.totalorder %v688_v36, 0 }
  0x7c   : > { %vm1945_vm1 = vcmp.ne.s32.totalorder %v687_v5, 0  ;;  %v623_v39 = vpack.c.b16 %v602_v22, %v602_v22  ;;  %v612_v5 = vunpack.c.3.s8 %v1914_v42 }
  0x7d   : > { %813 = vperm.xlu1 %1515, %v739_v58   ;;  %773 = vperm.xlu0 %1514, %v731_v59  }
  0x81   : > { %818 = vperm.xlu1 %1515, %v740_v60   ;;  %778 = vperm.xlu0 %1514, %v732_v61  }
  0xc4   : > { %v459_v12 = vpop.permute.xlu1 %458  ;;  %v454_v13 = vpop.permute.xlu0 %453 }
  0xc5   : > { %v537_v19 = vadd.f32 %v1901_v15, %v454_v13  ;;  %v538_v43 = vadd.f32 %v1901_v15, %v459_v12  ;;  %v601_v12 = vunpack.c.0.s8 %v1927_v57 }
  0xc7   : > { %v553_v32 = vmul.f32 0.2, %v537_v19  ;;  %v554_v55 = vmul.f32 0.2, %v538_v43 }
  0xc8   : > { %v499_v20 = vpop.permute.xlu1 %498  ;;  %v494_v21 = vpop.permute.xlu0 %493 }
  0xc9   : > { %v545_v24 = vadd.f32 %v1901_v15, %v494_v21  ;;  %v569_v46 = vmax.f32 %v537_v19, %v553_v32  ;;  %v546_v47 = vadd.f32 %v1901_v15, %v499_v20  ;;  %v570_v9 = vmax.f32 %v538_v43, %v554_v55 }
  0xca   : > { %v638_v19 = vpack.c.b8 %v637_v3, %v637_v3  ;;  %v610_v21 = vunpack.c.1.s8 %v1914_v42  ;;  %v621_v32 = vpack.c.b16 %v601_v12, %v601_v12 }
  0xcb   : > { %v561_v33 = vmul.f32 0.2, %v545_v24  ;;  %v562_v58 = vmul.f32 0.2, %v546_v47  ;;  %v709_v61 = vsel %vm693_vm11, %v569_v46, -1e+30 }
  0xcc   : > { %v504_v34 = vpop.permute.xlu1 %503  ;;  %v464_v35 = vpop.permute.xlu0 %463  ;;  %v710_v23 = vsel %vm1929_vm13, %v570_v9, -1e+30  ;;  %vm657_vm2 = vnez %v638_v19  ;;  %v639_v38 = vpack.c.b16 %v610_v21, %v610_v21 }
  0xcd   : > { %v577_v48 = vmax.f32 %v545_v24, %v561_v33  ;;  %v578_v13 = vmax.f32 %v546_v47, %v562_v58  ;;  %v547_v14 = vadd.f32 %v1901_v15, %v504_v34  ;;  %v539_v16 = vadd.f32 %v1901_v15, %v464_v35 }
  0xce   : > { %v679_v24 = vunpack.c.0.s8 %v663_v6  ;;  %v611_v35 = vunpack.c.2.s8 %v1914_v42  ;;  %v673_v52 = vsel %vm657_vm2, 16843009, %v1645_v7  ;;  %v640_v56 = vpack.c.b8 %v639_v38, %v639_v38 }
  0xcf   : > { %v717_v60 = vsel %vm701_vm10, %v577_v48, -1e+30  ;;  %v563_v27 = vmul.f32 0.2, %v547_v14  ;;  %v555_v28 = vmul.f32 0.2, %v539_v16 }
  0xd0   : > { %v509_v49 = vpop.permute.xlu1 %508  ;;  %v1919_v50 = vpop.permute.xlu0 %468  ;;  %v718_v29 = vsel %vm702_vm0, %v578_v13, -1e+30  ;;  %vm1967_vm3 = vcmp.ne.s32.totalorder %v679_v24, 0  ;;  %v641_v54 = vpack.c.b16 %v611_v35, %v611_v35  ;;  %vm658_vm7 = vnez %v640_v56 }
  0xd1   : > { %v1959_v40 = vadd.f32 %v1901_v15, %v509_v49  ;;  %v579_v45 = vmax.f32 %v547_v14, %v563_v27  ;;  %v571_v46 = vmax.f32 %v539_v16, %v555_v28  ;;  %v1964_v47 = vadd.f32 %v1901_v15, %v1919_v50 }
  0xd2   : > { %v622_v49 = vpack.c.b8 %v621_v32, %v621_v32  ;;  %v624_v50 = vpack.c.b8 %v623_v39, %v623_v39  ;;  %v642_v9 = vpack.c.b8 %v641_v54, %v641_v54 }
  0xd3   : > { %v711_v3 = vsel %vm1967_vm3, %v571_v46, -1e+30 }
  0xd4   : > { %v784_v59 = vpop.permute.xlu1 %783  ;;  %v744_v62 = vpop.permute.xlu0 %743  ;;  %vm649_vm6 = vnez %v622_v49  ;;  %vm650_vm8 = vnez %v624_v50  ;;  %vm2006_vm10 = vnez %v642_v9 }
  0xd5   : > { %v829_v0 = vsub.f32 %v717_v60, %v784_v59  ;;  %v821_v1 = vsub.f32 %v709_v61, %v744_v62  ;;  %v564_v59 = vmul.f32 0.2, %v1959_v40  ;;  %v689_v61 = vunpack.c.0.s8 %v673_v52 }
  0xd6   : > { %v625_v62 = vpack.c.b16 %v603_v44, %v603_v44  ;;  %v665_v22 = vsel %vm649_vm6, 16843009, %v1645_v7  ;;  %v675_v44 = vsel %vm2006_vm10, 16843009, %v1645_v7 }
  0xd7   : > { %v853_v10 = vmul.f32 1.442695, %v829_v0  ;;  %v837_v11 = vmul.f32 1.442695, %v821_v1  ;;  %v556_v0 = vmul.f32 0.2, %v1964_v47  ;;  %v580_v16 = vmax.f32 %v1959_v40, %v564_v59 }
  0xd8   : > { %v1941_v17 = vpop.permute.xlu1 %513  ;;  %v1943_v18 = vpop.permute.xlu0 %473  ;;  %v719_v1 = vsel %vm1945_vm1, %v579_v45, -1e+30  ;;  %v626_v14 = vpack.c.b8 %v625_v62, %v625_v62  ;;  %vm1999_vm9 = vcmp.ne.s32.totalorder %v689_v61, 0  ;;  %v691_v60 = vunpack.c.0.s8 %v675_v44 }
  0xd9   : > { %1516 = vpow2.f32 %v853_v10  ;;  %v1990_v10 = vadd.f32 %v1901_v15, %v1941_v17  ;;  %v1995_v12 = vadd.f32 %v1901_v15, %v1943_v18  ;;  %v572_v19 = vmax.f32 %v1964_v47, %v556_v0 }
  0xda   : > { %1518 = vpow2.f32 %v837_v11  ;;  %v604_v11 = vunpack.c.3.s8 %v1927_v57  ;;  %v643_v57 = vpack.c.b16 %v612_v5, %v612_v5  ;;  %v674_v18 = vsel %vm658_vm7, 16843009, %v1645_v7 }
  0xdb   : > { %v565_v25 = vmul.f32 0.2, %v1990_v10  ;;  %vm2018_vm11 = vnez %v626_v14  ;;  %v712_v36 = vsel %vm1976_vm5, %v572_v19, -1e+30  ;;  %v690_v38 = vunpack.c.0.s8 %v674_v18 }
  0xdc   : > { %v789_v30 = vpop.permute.xlu1 %788  ;;  %v749_v31 = vpop.permute.xlu0 %748  ;;  %v627_v27 = vpack.c.b16 %v604_v11, %v604_v11  ;;  %v644_v39 = vpack.c.b8 %v643_v57, %v643_v57  ;;  %v667_v47 = vsel %vm2018_vm11, 16843009, %v1645_v7  ;;  %vm2063_vm1 = vcmp.ne.s32.totalorder %v691_v60, 0 }
  0xdd   : > { %v830_v33 = vsub.f32 %v718_v29, %v789_v30  ;;  %v822_v34 = vsub.f32 %v710_v23, %v749_v31  ;;  %v666_v23 = vsel %vm650_vm8, 16843009, %v1645_v7  ;;  %v557_v29 = vmul.f32 0.2, %v1995_v12 }
  0xde   : > { %v681_v31 = vunpack.c.0.s8 %v665_v22  ;;  %v581_v45 = vmax.f32 %v1990_v10, %v565_v25  ;;  %vm660_vm13 = vnez %v644_v39  ;;  %vm2040_vm14 = vcmp.ne.s32.totalorder %v690_v38, 0 }
  0xdf   : > { %v855_v41 = vmul.f32 1.442695, %v830_v33  ;;  %v839_v43 = vmul.f32 1.442695, %v822_v34  ;;  %v720_v34 = vsel %vm1971_vm4, %v580_v16, -1e+30  ;;  %v683_v62 = vunpack.c.0.s8 %v667_v47 }
  0xe0   : > { %v519_v48 = vpop.permute.xlu1 %518  ;;  %v479_v51 = vpop.permute.xlu0 %478  ;;  %vm697_vm12 = vcmp.ne.s32.totalorder %v681_v31, 0 }
  0xe1   : > { %1520 = vpow2.f32 %v855_v41  ;;  %v2012_v26 = vadd.f32 %v1901_v15, %v519_v48  ;;  %v2016_v30 = vadd.f32 %v1901_v15, %v479_v51  ;;  %v628_v48 = vpack.c.b8 %v627_v27, %v627_v27 }
  0xe2   : > { %1522 = vpow2.f32 %v839_v43  ;;  %v682_v43 = vunpack.c.0.s8 %v666_v23  ;;  %v573_v51 = vmax.f32 %v1995_v12, %v557_v29  ;;  %vm2067_vm2 = vcmp.ne.s32.totalorder %v683_v62, 0 }
  0xe3   : > { %v1517_v58 = vpop.eup %1516  ;;  %v566_v46 = vmul.f32 0.2, %v2012_v26  ;;  %v558_v52 = vmul.f32 0.2, %v2016_v30  ;;  %vm2049_vm0 = vnez %v628_v48 }
  0xe4   : > { %v1519_v63 = vpop.eup %1518  ;;  %877 = vst [vmem:[%s1807_s2 + $0x40] sm:$0xff] %v1517_v58  ;;  %v794_v2 = vpop.permute.xlu1 %793  ;;  %1378 = vmatprep.mubr.f32.mxu1 %v1517_v58  ;;  %vm2044_vm15 = vcmp.ne.s32.totalorder %v682_v43, 0 }
  0xe5   : > { %v754_v4 = vpop.permute.xlu0 %753  ;;  %869 = vst [vmem:[%s1807_s2] sm:$0xff] %v1519_v63  ;;  %v831_v6 = vsub.f32 %v719_v1, %v794_v2  ;;  %1366 = vmatprep.mubr.f32.mxu0 %v1519_v63  ;;  %v582_v61 = vmax.f32 %v2012_v26, %v566_v46  ;;  %v574_v1 = vmax.f32 %v2016_v30, %v558_v52  ;;  %v721_v2 = vsel %vm1999_vm9, %v581_v45, -1e+30 }
  0xe6   : > { %v823_v8 = vsub.f32 %v711_v3, %v754_v4  ;;  %v713_v3 = vsel %vm697_vm12, %v573_v51, -1e+30  ;;  %v676_v4 = vsel %vm660_vm13, 16843009, %v1645_v7 }
  0xe7   : > { %v857_v13 = vmul.f32 1.442695, %v831_v6  ;;  %v722_v14 = vsel %vm2040_vm14, %v582_v61, -1e+30  ;;  %v714_v17 = vsel %vm2044_vm15, %v574_v1, -1e+30  ;;  %v692_v22 = vunpack.c.0.s8 %v676_v4 }
  0xe8   : > { %v841_v42 = vmul.f32 1.442695, %v823_v8  ;;  %v524_v20 = vpop.permute.xlu1 %523 }
  0xe9   : > { %v484_v21 = vpop.permute.xlu0 %483  ;;  %1524 = vpow2.f32 %v857_v13  ;;  %v551_v54 = vadd.f32 %v1901_v15, %v524_v20  ;;  %vm2076_vm3 = vcmp.ne.s32.totalorder %v692_v22, 0 }
  0xea   : > { %1526 = vpow2.f32 %v841_v42  ;;  %v543_v55 = vadd.f32 %v1901_v15, %v484_v21 }
  0xeb   : > { %v1521_v28 = vpop.eup %1520  ;;  %v567_v6 = vmul.f32 0.2, %v551_v54 }
  0xec   : > { %v1523_v33 = vpop.eup %1522  ;;  %878 = vst [vmem:[%s1807_s2 + $0x48] sm:$0xff] %v1521_v28  ;;  %v799_v35 = vpop.permute.xlu1 %798  ;;  %1379 = vmatmul.mubr.f32.vlgmr.msra.gmra.mrb[0].mxu1 %v1521_v28  ;;  %v559_v8 = vmul.f32 0.2, %v543_v55 }
  0xed   : > { %v759_v37 = vpop.permute.xlu0 %758  ;;  %870 = vst [vmem:[%s1807_s2 + $0x8] sm:$0xff] %v1523_v33  ;;  %v832_v40 = vsub.f32 %v720_v34, %v799_v35  ;;  %1367 = vmatmul.mubr.f32.vlgmr.msra.gmra.mrb[0].mxu0 %v1523_v33  ;;  %v583_v57 = vmax.f32 %v551_v54, %v567_v6 }
  0xee   : > { %v824_v41 = vsub.f32 %v712_v36, %v759_v37  ;;  %v575_v18 = vmax.f32 %v543_v55, %v559_v8 }
  0xef   : > { %v859_v53 = vmul.f32 1.442695, %v832_v40  ;;  %v723_v36 = vsel %vm2063_vm1, %v583_v57, -1e+30 }
  0xf0   : > { %v843_v49 = vmul.f32 1.442695, %v824_v41  ;;  %v529_v56 = vpop.permute.xlu1 %528  ;;  %v715_v38 = vsel %vm2067_vm2, %v575_v18, -1e+30 }
  0xf1   : > { %v489_v50 = vpop.permute.xlu0 %488  ;;  %1528 = vpow2.f32 %v859_v53  ;;  %v552_v9 = vadd.f32 %v1901_v15, %v529_v56 }
  0xf2   : > { %1530 = vpow2.f32 %v843_v49  ;;  %v544_v10 = vadd.f32 %v1901_v15, %v489_v50  ;;  %v668_v15 = vsel %vm2049_vm0, 16843009, %v1645_v7 }
  0xf3   : > { %v1525_v0 = vpop.eup %1524  ;;  %v568_v23 = vmul.f32 0.2, %v552_v9  ;;  %v684_v29 = vunpack.c.0.s8 %v668_v15 }
  0xf4   : > { %v1527_v5 = vpop.eup %1526  ;;  %879 = vst [vmem:[%s1807_s2 + $0x50] sm:$0xff] %v1525_v0  ;;  %v804_v11 = vpop.permute.xlu1 %803  ;;  %1381 = vmatprep.mubr.f32.mxu1 %v1525_v0  ;;  %v560_v24 = vmul.f32 0.2, %v544_v10 }
  0xf5   : > { %v764_v12 = vpop.permute.xlu0 %763  ;;  %871 = vst [vmem:[%s1807_s2 + $0x10] sm:$0xff] %v1527_v5  ;;  %v833_v13 = vsub.f32 %v721_v2, %v804_v11  ;;  %1369 = vmatprep.mubr.f32.mxu0 %v1527_v5  ;;  %v584_v34 = vmax.f32 %v552_v9, %v568_v23  ;;  %vm700_vm4 = vcmp.ne.s32.totalorder %v684_v29, 0 }
  0xf6   : > { %v825_v42 = vsub.f32 %v713_v3, %v764_v12  ;;  %v576_v35 = vmax.f32 %v544_v10, %v560_v24 }
  0xf7   : > { %v861_v20 = vmul.f32 1.442695, %v833_v13  ;;  %v724_v45 = vsel %vm2076_vm3, %v584_v34, -1e+30 }
  0xf8   : > { %v845_v21 = vmul.f32 1.442695, %v825_v42  ;;  %v809_v25 = vpop.permute.xlu1 %808  ;;  %v716_v47 = vsel %vm700_vm4, %v576_v35, -1e+30 }
  0xf9   : > { %v769_v26 = vpop.permute.xlu0 %768  ;;  %1532 = vpow2.f32 %v861_v20  ;;  %v834_v27 = vsub.f32 %v722_v14, %v809_v25 }
  0xfa   : > { %v826_v28 = vsub.f32 %v714_v17, %v769_v26  ;;  %1534 = vpow2.f32 %v845_v21 }
  0xfb   : > { %v1529_v7 = vpop.eup %1528  ;;  %v863_v30 = vmul.f32 1.442695, %v834_v27 }
  0xfc   : > { %v847_v31 = vmul.f32 1.442695, %v826_v28  ;;  %v1531_v33 = vpop.eup %1530  ;;  %880 = vst [vmem:[%s1807_s2 + $0x58] sm:$0xff] %v1529_v7  ;;  %v814_v37 = vpop.permute.xlu1 %813  ;;  %1382 = vmatmul.mubr.f32.gmra.mrb[2].mxu1 %v1529_v7 }
  0xfd   : > { %v774_v39 = vpop.permute.xlu0 %773  ;;  %872 = vst [vmem:[%s1807_s2 + $0x18] sm:$0xff] %v1531_v33  ;;  %1536 = vpow2.f32 %v863_v30  ;;  %v835_v40 = vsub.f32 %v723_v36, %v814_v37  ;;  %1370 = vmatmul.mubr.f32.gmra.mrb[2].mxu0 %v1531_v33 }
  0xfe   : > { %v827_v41 = vsub.f32 %v715_v38, %v774_v39  ;;  %1538 = vpow2.f32 %v847_v31 }
  0xff   : > { %v865_v43 = vmul.f32 1.442695, %v835_v40 }
 0x100   : > { %v849_v44 = vmul.f32 1.442695, %v827_v41  ;;  %v819_v46 = vpop.permute.xlu1 %818 }
 0x101   : > { %v779_v48 = vpop.permute.xlu0 %778  ;;  %1540 = vpow2.f32 %v865_v43  ;;  %v836_v51 = vsub.f32 %v724_v45, %v819_v46 }
 0x102   : > { %v828_v52 = vsub.f32 %v716_v47, %v779_v48  ;;  %1542 = vpow2.f32 %v849_v44 }
 0x103   : > { %v1533_v53 = vpop.eup %1532  ;;  %v867_v49 = vmul.f32 1.442695, %v836_v51 }
 0x104   : > { %v851_v54 = vmul.f32 1.442695, %v828_v52  ;;  %v1535_v55 = vpop.eup %1534  ;;  %881 = vst [vmem:[%s1807_s2 + $0x60] sm:$0xff] %v1533_v53  ;;  %1384 = vmatprep.mubr.f32.mxu1 %v1533_v53 }
 0x105   : > { %873 = vst [vmem:[%s1807_s2 + $0x20] sm:$0xff] %v1535_v55  ;;  %1544 = vpow2.f32 %v867_v49  ;;  %1372 = vmatprep.mubr.f32.mxu0 %v1535_v55 }
 0x106   : > { %1546 = vpow2.f32 %v851_v54 }
 0x107   : > { %v1537_v56 = vpop.eup %1536 }
 0x108   : > { %v1539_v50 = vpop.eup %1538  ;;  %882 = vst [vmem:[%s1807_s2 + $0x68] sm:$0xff] %v1537_v56  ;;  %1385 = vmatmul.mubr.f32.gmra.mrb[4].mxu1 %v1537_v56 }
 0x109   : > { %874 = vst [vmem:[%s1807_s2 + $0x28] sm:$0xff] %v1539_v50  ;;  %1373 = vmatmul.mubr.f32.gmra.mrb[4].mxu0 %v1539_v50 }
 0x10b   : > { %v1541_v58 = vpop.eup %1540 }
 0x10c   : > { %v1543_v59 = vpop.eup %1542  ;;  %883 = vst [vmem:[%s1807_s2 + $0x70] sm:$0xff] %v1541_v58  ;;  %1387 = vmatprep.mubr.f32.mxu1 %v1541_v58 }
 0x10d   : > { %875 = vst [vmem:[%s1807_s2 + $0x30] sm:$0xff] %v1543_v59  ;;  %1375 = vmatprep.mubr.f32.mxu0 %v1543_v59 }
 0x10f   : > { %v1545_v60 = vpop.eup %1544 }
 0x110   : > { %v1547_v61 = vpop.eup %1546  ;;  %884 = vst [vmem:[%s1807_s2 + $0x78] sm:$0xff] %v1545_v60  ;;  %1388 = vmatmul.mubr.f32.gmra.mrb[6].mxu1 %v1545_v60 }
 0x111   : > { %876 = vst [vmem:[%s1807_s2 + $0x38] sm:$0xff] %v1547_v61  ;;  %1376 = vmatmul.mubr.f32.gmra.mrb[6].mxu0 %v1547_v61 }
 0x112   : > { %1561 = shalt.err (!%p1558_p13)
}
 0x113   : > { %s1562_s29 = scalar_lea.hbm %s2102_s17, 2048  ;;  %s1566_s15 = scalar_lea.hbm %s2211_s5, 8192 }
 0x114   : > { %p1563_p0 = scmp.ne.s32.totalorder %s2102_s17, %s1562_s29  ;;  %p1567_p3 = scmp.lt.u32.totalorder %s2102_s17, %s2211_s5 }
 0x115   : > { %p1568_p4 = scmp.lt.u32.totalorder %s1566_s15, %s1562_s29  ;;  %p1570_p6 = scmp.lt.u32.totalorder %s1562_s29, %s2102_s17 }
 0x116   : > { %p1564_p1 = pnand %p1563_p0, %p1745_p8 }
 0x117   : > { %p1569_p5 = por %p1568_p4, %p1567_p3 }
 0x118   : > { %p1565_p2 = pneg %p1564_p1 }
 0x119   : > { %p1571_p7 = por %p1570_p6, %p1569_p5 }
 0x11b   : > { %p1572_p10 = pnand %p1571_p7, %p1565_p2 }
 0x11d   : > { %1575 = shalt.err (!%p1572_p10)
}
 0x11e   : > { %s1647_s2 = smov 128   ;;  %s1648_s23 = smov 256   ;;  %v894_v62 = vld [vmem:[%s1798_s22 + $0x48] sm:$0xff]  ;;  %v893_v0 = vld [vmem:[%s1798_s22 + $0x40] sm:$0xff]  ;;  %vm1078_vm5 = vcmask 130048   ;;  %v896_v11 = vld [vmem:[%s1798_s22 + $0x58] sm:$0xff] }
 0x11f   : > { %s1649_s26 = smov 8   ;;  %v886_v63 = vld [vmem:[%s1798_s22 + $0x8] sm:$0xff]  ;;  %v885_v2 = vld [vmem:[%s1798_s22] sm:$0xff]  ;;  %v888_v12 = vld [vmem:[%s1798_s22 + $0x18] sm:$0xff] }
 0x120   : > { %1438 = dma.vmem_to_hbm [thread:$0]  (%p1745_p8), %s2104_s8, 2048, %s2102_s17, %s1096_s18, %s1647_s2, %s1648_s23, %s1649_s26  }
 0x121   : > { %v895_v13 = vld [vmem:[%s1798_s22 + $0x50] sm:$0xff]  ;;  %v898_v57 = vld [vmem:[%s1798_s22 + $0x68] sm:$0xff]  ;;  %v897_v23 = vld [vmem:[%s1798_s22 + $0x60] sm:$0xff] }
 0x122   : > { %v887_v14 = vld [vmem:[%s1798_s22 + $0x10] sm:$0xff]  ;;  %v890_v18 = vld [vmem:[%s1798_s22 + $0x28] sm:$0xff]  ;;  %v889_v25 = vld [vmem:[%s1798_s22 + $0x20] sm:$0xff] }
 0x123   : > { %v900_v32 = vld [vmem:[%s1798_s22 + $0x78] sm:$0xff]  ;;  %v899_v34 = vld [vmem:[%s1798_s22 + $0x70] sm:$0xff] }
 0x124   : > { %v892_v33 = vld [vmem:[%s1798_s22 + $0x38] sm:$0xff]  ;;  %v891_v36 = vld [vmem:[%s1798_s22 + $0x30] sm:$0xff] }
 0x1bf   : > { %v1380_v1 = vpop.f32.mrb[0].mxu1 }
 0x1c0   : > { %v1368_v3 = vpop.f32.mrb[0].mxu0  ;;  %v1071_v4 = vadd.f32 %v1380_v1, %v894_v62  ;;  %v1023_v5 = vpop.f32.mrb[1].mxu1 }
 0x1c1   : > { %v1063_v6 = vadd.f32 %v1368_v3, %v886_v63  ;;  %v983_v8 = vpop.f32.mrb[1].mxu0  ;;  %v1070_v9 = vadd.f32 %v1023_v5, %v893_v0 }
 0x1c2   : > { %1088 = vst.msk [vmem:[%s1798_s22 + $0x48] sm:$0xff] %vm1078_vm5, %v1071_v4  ;;  %v1062_v10 = vadd.f32 %v983_v8, %v885_v2 }
 0x1c3   : > { %1080 = vst.msk [vmem:[%s1798_s22 + $0x8] sm:$0xff] %vm1078_vm5, %v1063_v6  ;;  %1087 = vst.msk [vmem:[%s1798_s22 + $0x40] sm:$0xff] %vm1078_vm5, %v1070_v9 }
 0x1c4   : > { %1079 = vst.msk [vmem:[%s1798_s22] sm:$0xff] %vm1078_vm5, %v1062_v10 }
 0x1cf   : > { %v1383_v42 = vpop.f32.mrb[2].mxu1 }
 0x1d0   : > { %v1371_v16 = vpop.f32.mrb[2].mxu0  ;;  %v1073_v19 = vadd.f32 %v1383_v42, %v896_v11  ;;  %v1033_v15 = vpop.f32.mrb[3].mxu1 }
 0x1d1   : > { %v1065_v20 = vadd.f32 %v1371_v16, %v888_v12  ;;  %v993_v21 = vpop.f32.mrb[3].mxu0  ;;  %v1072_v17 = vadd.f32 %v1033_v15, %v895_v13 }
 0x1d2   : > { %1090 = vst.msk [vmem:[%s1798_s22 + $0x58] sm:$0xff] %vm1078_vm5, %v1073_v19  ;;  %v1064_v22 = vadd.f32 %v993_v21, %v887_v14 }
 0x1d3   : > { %1082 = vst.msk [vmem:[%s1798_s22 + $0x18] sm:$0xff] %vm1078_vm5, %v1065_v20  ;;  %1089 = vst.msk [vmem:[%s1798_s22 + $0x50] sm:$0xff] %vm1078_vm5, %v1072_v17 }
 0x1d4   : > { %1081 = vst.msk [vmem:[%s1798_s22 + $0x10] sm:$0xff] %vm1078_vm5, %v1064_v22 }
 0x1db   : > { %v1386_v24 = vpop.f32.mrb[4].mxu1 }
 0x1dc   : > { %v1374_v26 = vpop.f32.mrb[4].mxu0  ;;  %v1075_v27 = vadd.f32 %v1386_v24, %v898_v57  ;;  %v1043_v28 = vpop.f32.mrb[5].mxu1 }
 0x1dd   : > { %v1067_v29 = vadd.f32 %v1374_v26, %v890_v18  ;;  %v1003_v7 = vpop.f32.mrb[5].mxu0  ;;  %v1074_v30 = vadd.f32 %v1043_v28, %v897_v23 }
 0x1de   : > { %1092 = vst.msk [vmem:[%s1798_s22 + $0x68] sm:$0xff] %vm1078_vm5, %v1075_v27  ;;  %v1066_v31 = vadd.f32 %v1003_v7, %v889_v25 }
 0x1df   : > { %1084 = vst.msk [vmem:[%s1798_s22 + $0x28] sm:$0xff] %vm1078_vm5, %v1067_v29  ;;  %1091 = vst.msk [vmem:[%s1798_s22 + $0x60] sm:$0xff] %vm1078_vm5, %v1074_v30 }
 0x1e0   : > { %1083 = vst.msk [vmem:[%s1798_s22 + $0x20] sm:$0xff] %vm1078_vm5, %v1066_v31 }
 0x1e3   : > { %v1389_v35 = vpop.f32.mrb[6].mxu1 }
 0x1e4   : > { %v1377_v37 = vpop.f32.mrb[6].mxu0  ;;  %v1077_v38 = vadd.f32 %v1389_v35, %v900_v32  ;;  %v1053_v39 = vpop.f32.mrb[7].mxu1 }
 0x1e5   : > { %v1069_v40 = vadd.f32 %v1377_v37, %v892_v33  ;;  %v1013_v41 = vpop.f32.mrb[7].mxu0  ;;  %v1076_v43 = vadd.f32 %v1053_v39, %v899_v34 }
 0x1e6   : > { %1094 = vst.msk [vmem:[%s1798_s22 + $0x78] sm:$0xff] %vm1078_vm5, %v1077_v38  ;;  %v1068_v44 = vadd.f32 %v1013_v41, %v891_v36 }
 0x1e7   : > { %1086 = vst.msk [vmem:[%s1798_s22 + $0x38] sm:$0xff] %vm1078_vm5, %v1069_v40  ;;  %1093 = vst.msk [vmem:[%s1798_s22 + $0x70] sm:$0xff] %vm1078_vm5, %v1076_v43 }
 0x1e8   : > { %1085 = vst.msk [vmem:[%s1798_s22 + $0x30] sm:$0xff] %vm1078_vm5, %v1068_v44 }
 0x1e9 PF: > { %p1444_p8 = scmp.ge.s32.totalorder %s1642_s28, 2  ;;  %s1135_s10 = sand.u32 1, %s1614_s21  }
 0x1ea   : > { %s1136_s0 = scalar_lea.sflag [#allocation4], %s1135_s10 }
 0x1eb   : > { %p1441_p11 = pnand %p1444_p8, %p1749_p9 }
 0x1ed   : > { %1609 = dma.done.wait (!%p1441_p11), %s1136_s0, 2048  }
 0x1ee   : > { %1611 = vsyncadd (!%p1441_p11), %s1136_s0, 4294965248  ;;  %s20_s28 = sadd.s32 1, %s1642_s28   ;;  %s2268_s21 = sld [smem:[#allocation6_spill]] }
 0x1ef   : > { %p17_p12 = scmp.ge.s32.totalorder %s20_s28, 6   ;;  %s2269_s22 = sld [smem:[#allocation7_spill]] }
 0x1f0   : > { %s2270_s23 = sld [smem:[#allocation13_spill]]  ;;  %s2271_s24 = sld [smem:[#allocation8_spill]] }
 0x1f1   : > { %s2272_s25 = sld [smem:[#allocation9_spill]]  ;;  %s2273_s26 = sld [smem:[#allocation10_spill]] }
 0x1f2   : > { %s2274_s27 = sld [smem:[#allocation11_spill]]  ;;  %19 = sbr.rel (!%p17_p12) target bundleno = 8 (0x8), region = 146 }
 0x1f9   :  { %1149 = vsyncpa [#allocation4], 1 }
 0x1fa   :  { %1151 = vsyncpa [#allocation4 + $0x1], 1 }

// kernel: graph_attention_forward.2
= control target key start
LH: loop header
LB: loop body
LE: loop exit
PB: predicated region body
PF: predicated region fallthrough
CT: control target
= control target key end

     0   :  { %s1791_s15 = smov 0   ;;  %s1793_s16 = smov 0   ;;  %s2579_s0 = inlined_call_operand.vmem [shape: f32[256,1], index: 0, kind: input, shape index: {}]   ;;  %s2580_s1 = inlined_call_operand.vmem [shape: f32[1,256], index: 1, kind: input, shape index: {}]   ;;  %s2581_s2 = inlined_call_operand.vmem [shape: s8[256,256], index: 2, kind: input, shape index: {}]   ;;  %s2582_s3 = inlined_call_operand.vmem [shape: f32[256,1], index: 3, kind: input, shape index: {}]   ;;  %s2583_s4 = inlined_call_operand.vmem [shape: f32[256,1], index: 4, kind: output, shape index: {}]  }
   0x1   :  { %s1795_s17 = smov 0   ;;  %s1797_s18 = smov 0  }
   0x2   :  { %s1799_s19 = smov 0   ;;  %s1801_s20 = smov 0  }
   0x3   :  { %s1803_s21 = smov 0  }
   0x4 LB: > { %s23_s22 = sadd.s32 1, %s1752_s19  ;;  %s26_s23 = sadd.s32 1, %s1756_s20  ;;  %s1760_s21 = sphi %s1803_s21, %s14_s21   ;;  %s1756_s20 = sphi %s1801_s20, %s2656_s20   ;;  %s1752_s19 = sphi %s1799_s19, %s2655_s19   ;;  %s1748_s18 = sphi %s1797_s18, %s2654_s18   ;;  %s1744_s17 = sphi %s1795_s17, %s2653_s17   ;;  %s1740_s16 = sphi %s1793_s16, %s2652_s16   ;;  %s1736_s15 = sphi %s1791_s15, %s2651_s15  }
   0x5   : > { %p24_p0 = scmp.ge.s32.totalorder %s23_s22, 2  ;;  %p94_p1 = scmp.ne.s32.totalorder %s1740_s16, %s1736_s15 }
   0x6   : > { %p95_p2 = scmp.eq.s32.totalorder %s1760_s21, 0  ;;  %s87_s27 = sadd.s32 1, %s1740_s16 }
   0x7   : > { %s2658_s22 = smov (%p24_p0, %s23_s22), 0  ;;  %s2660_s23 = smov (!%p24_p0, %s26_s23), %s1756_s20 }
   0x8   : > { %p96_p3 = por %p95_p2, %p94_p1  ;;  %p28_p4 = scmp.ge.s32.totalorder %s2660_s23, 2 }
   0x9   : > { %s83_s24 = ssub.s32 %s1752_s19, %s2658_s22  ;;  %p1409_p6 = scmp.ge.s32.totalorder %s1760_s21, 4 }
   0xa   : > { %s2662_s23 = smov (%p28_p4, %s2660_s23), 0 }
   0xb   : > { %s82_s25 = ssub.s32 %s1756_s20, %s2662_s23  ;;  %172 = sbr.rel (%p1409_p6) target bundleno = 26 (0x1a), region = 16 }
   0xc   : > { %s84_s26 = sor.u32 %s83_s24, %s82_s25 }
   0xd   : > { %p85_p5 = scmp.eq.s32.totalorder %s84_s26, 0 }
   0xf   : > { %s1842_s28 = scalar_select %p85_p5, %s1740_s16, %s87_s27  }
  0x12   : > { %190 = sbr.rel (!%p96_p3) target bundleno = 26 (0x1a), region = 28  ;;  %s192_s29 = sand.u32 (%p96_p3), 1, %s1740_s16  }
  0x13   : > { %s1427_s30 = sshll.u32 (%p96_p3), %s1756_s20, 3  ;;  %s1410_s5 = sshll.u32 (%p96_p3), %s192_s29, 5 }
  0x14   : > { %s197_s6 = sadd.s32 (%p96_p3), %s1752_s19, %s1427_s30  ;;  %s194_s11 = scalar_lea.vmem (%p96_p3), [#allocation4], %s1410_s5 }
  0x15   : > { %s1413_s7 = sshll.u32 (%p96_p3), %s197_s6, 3 }
  0x16   : > { %s199_s10 = scalar_lea.vmem (%p96_p3), %s2581_s2, %s1413_s7 }
  0x17   : > { %v233_v0 = vld [vmem:[%s199_s10] sm:$0xff] (%p96_p3)  ;;  %v235_v1 = vld [vmem:[%s199_s10 + $0x10] sm:$0xff] (%p96_p3) }
  0x18   : > { %v237_v2 = vld [vmem:[%s199_s10 + $0x20] sm:$0xff] (%p96_p3)  ;;  %234 = vst [vmem:[%s194_s11] sm:$0xff] (%p96_p3), %v233_v0  ;;  %236 = vst [vmem:[%s194_s11 + $0x8] sm:$0xff] (%p96_p3), %v235_v1  ;;  %v239_v3 = vld [vmem:[%s199_s10 + $0x30] sm:$0xff] (%p96_p3) }
  0x19   : > { %238 = vst [vmem:[%s194_s11 + $0x10] sm:$0xff] %v237_v2  ;;  %240 = vst [vmem:[%s194_s11 + $0x18] sm:$0xff] %v239_v3 }
  0x1a PF: > { %p1414_p7 = scmp.ge.s32.totalorder %s1760_s21, 1  ;;  %p254_p8 = scmp.lt.s32.totalorder %s1760_s21, 5 }
  0x1c   : > { %p255_p9 = pnand %p1414_p7, %p254_p8 }
  0x1d   : > { %s261_s12 = sand.u32 (!%p255_p9), 1, %s1736_s15   ;;  %s1416_s13 = sshll.u32 (!%p255_p9), %s1748_s18, 4 }
  0x1e   : > { %258 = sbr.rel (%p255_p9) target bundleno = 759 (0x2f7), region = 70  ;;  %s1415_s14 = sshll.u32 (!%p255_p9), %s261_s12, 5 }
  0x1f   : > { %p300_p10 = scmp.lt.s32.totalorder (!%p255_p9), %s1416_s13, 31  ;;  %p305_p11 = scmp.lt.s32.totalorder (!%p255_p9), %s1744_s17, 1 }
  0x20   : > { %s1878_s11 = scalar_lea.vmem (!%p255_p9), [#allocation4], %s1415_s14  ;;  %p1422_p12 = scmp.ne.s32.totalorder (!%p255_p9), %s1744_s17, 0 }
  0x25   : > { %s2664_s13 = smov (!%p300_p10, %s1416_s13), 31  ;;  %326 = sbr.rel (%p1422_p12) target bundleno = 56 (0x38), region = 78 }
  0x26   : > { %s1857_s24 = scalar_select %p305_p11, %s1744_s17, 1 }
  0x27   : > { %s1417_s25 = sshll.u32 %s2664_s13, 3  ;;  %vm327_vm0 = vcmask (!%p1422_p12), 7168   ;;  %v1762_v4 = vmov (!%p1422_p12), -1e+30   ;;  %v1763_v5 = vmov (!%p1422_p12), 0.0  }
  0x28   : > { %s1862_s29 = scalar_lea.vmem %s2579_s0, %s1417_s25  ;;  %s307_s6 = scalar_lea.vmem %s2580_s1, %s1857_s24  ;;  %328 = vst.msk [vmem:[#allocation2] sm:$0xff] (!%p1422_p12), %vm327_vm0, %v1762_v4  ;;  %329 = vst.msk [vmem:[#allocation2 + $0x8] sm:$0xff] (!%p1422_p12), %vm327_vm0, %v1762_v4 }
  0x29   : > { %s1871_s18 = scalar_lea.vmem %s2582_s3, %s1417_s25  ;;  %s1876_s10 = scalar_lea.vmem %s2583_s4, %s1417_s25  ;;  %330 = vst.msk [vmem:[#allocation2 + $0x10] sm:$0xff] (!%p1422_p12), %vm327_vm0, %v1762_v4  ;;  %331 = vst.msk [vmem:[#allocation2 + $0x18] sm:$0xff] (!%p1422_p12), %vm327_vm0, %v1762_v4 }
  0x2a   : > { %332 = vst.msk [vmem:[#allocation2 + $0x20] sm:$0xff] (!%p1422_p12), %vm327_vm0, %v1762_v4  ;;  %333 = vst.msk [vmem:[#allocation2 + $0x28] sm:$0xff] (!%p1422_p12), %vm327_vm0, %v1762_v4 }
  0x2b   : > { %334 = vst.msk [vmem:[#allocation2 + $0x30] sm:$0xff] (!%p1422_p12), %vm327_vm0, %v1762_v4  ;;  %335 = vst.msk [vmem:[#allocation2 + $0x38] sm:$0xff] (!%p1422_p12), %vm327_vm0, %v1762_v4 }
  0x2c   : > { %336 = vst.msk [vmem:[#allocation2 + $0x40] sm:$0xff] %vm327_vm0, %v1762_v4  ;;  %337 = vst.msk [vmem:[#allocation2 + $0x48] sm:$0xff] %vm327_vm0, %v1762_v4 }
  0x2d   : > { %338 = vst.msk [vmem:[#allocation2 + $0x50] sm:$0xff] %vm327_vm0, %v1762_v4  ;;  %339 = vst.msk [vmem:[#allocation2 + $0x58] sm:$0xff] %vm327_vm0, %v1762_v4 }
  0x2e   : > { %340 = vst.msk [vmem:[#allocation2 + $0x60] sm:$0xff] %vm327_vm0, %v1762_v4  ;;  %341 = vst.msk [vmem:[#allocation2 + $0x68] sm:$0xff] %vm327_vm0, %v1762_v4 }
  0x2f   : > { %342 = vst.msk [vmem:[#allocation2 + $0x70] sm:$0xff] %vm327_vm0, %v1762_v4  ;;  %343 = vst.msk [vmem:[#allocation2 + $0x78] sm:$0xff] %vm327_vm0, %v1762_v4 }
  0x30   : > { %344 = vst.msk [vmem:[#allocation3] sm:$0xff] %vm327_vm0, %v1763_v5  ;;  %345 = vst.msk [vmem:[#allocation3 + $0x8] sm:$0xff] %vm327_vm0, %v1763_v5 }
  0x31   : > { %346 = vst.msk [vmem:[#allocation3 + $0x10] sm:$0xff] %vm327_vm0, %v1763_v5  ;;  %347 = vst.msk [vmem:[#allocation3 + $0x18] sm:$0xff] %vm327_vm0, %v1763_v5 }
  0x32   : > { %348 = vst.msk [vmem:[#allocation3 + $0x20] sm:$0xff] %vm327_vm0, %v1763_v5  ;;  %349 = vst.msk [vmem:[#allocation3 + $0x28] sm:$0xff] %vm327_vm0, %v1763_v5 }
  0x33   : > { %350 = vst.msk [vmem:[#allocation3 + $0x30] sm:$0xff] %vm327_vm0, %v1763_v5  ;;  %351 = vst.msk [vmem:[#allocation3 + $0x38] sm:$0xff] %vm327_vm0, %v1763_v5 }
  0x34   : > { %352 = vst.msk [vmem:[#allocation3 + $0x40] sm:$0xff] %vm327_vm0, %v1763_v5  ;;  %353 = vst.msk [vmem:[#allocation3 + $0x48] sm:$0xff] %vm327_vm0, %v1763_v5 }
  0x35   : > { %354 = vst.msk [vmem:[#allocation3 + $0x50] sm:$0xff] %vm327_vm0, %v1763_v5  ;;  %355 = vst.msk [vmem:[#allocation3 + $0x58] sm:$0xff] %vm327_vm0, %v1763_v5 }
  0x36   : > { %356 = vst.msk [vmem:[#allocation3 + $0x60] sm:$0xff] %vm327_vm0, %v1763_v5  ;;  %357 = vst.msk [vmem:[#allocation3 + $0x68] sm:$0xff] %vm327_vm0, %v1763_v5 }
  0x37   : > { %358 = vst.msk [vmem:[#allocation3 + $0x70] sm:$0xff] %vm327_vm0, %v1763_v5  ;;  %359 = vst.msk [vmem:[#allocation3 + $0x78] sm:$0xff] %vm327_vm0, %v1763_v5 }
  0x38 PF: > { %v361_v6 = vld [vmem:[%s1862_s29 + $0x8] sm:$0xff]  ;;  %v360_v7 = vld [vmem:[%s1862_s29] sm:$0xff]  ;;  %v1764_v8 = vmov 0   ;;  %v370_v11 = vld [vmem:[%s1862_s29 + $0x50] sm:$0xff]  ;;  %p1424_p13 = scmp.ne.s32.totalorder %s1744_s17, 1 }
  0x39   : > { %1609 = vset.pattern.permute.xlu1 %v1764_v8  ;;  %1608 = vset.pattern.permute.xlu0 %v1764_v8  ;;  %v369_v9 = vld [vmem:[%s1862_s29 + $0x48] sm:$0xff]  ;;  %v368_v10 = vld [vmem:[%s1862_s29 + $0x40] sm:$0xff]  ;;  %v362_v12 = vld [vmem:[%s1862_s29 + $0x10] sm:$0xff] }
  0x3a   : > { %384 = vperm.xlu1 %1609, %v361_v6   ;;  %379 = vperm.xlu0 %1608, %v360_v7   ;;  %v371_v13 = vld [vmem:[%s1862_s29 + $0x58] sm:$0xff]  ;;  %v372_v15 = vld [vmem:[%s1862_s29 + $0x60] sm:$0xff]  ;;  %v373_v17 = vld [vmem:[%s1862_s29 + $0x68] sm:$0xff] }
  0x3b   : > { %v363_v14 = vld [vmem:[%s1862_s29 + $0x18] sm:$0xff]  ;;  %v364_v16 = vld [vmem:[%s1862_s29 + $0x20] sm:$0xff]  ;;  %v365_v18 = vld [vmem:[%s1862_s29 + $0x28] sm:$0xff] }
  0x3c   : > { %v374_v19 = vld [vmem:[%s1862_s29 + $0x70] sm:$0xff]  ;;  %v375_v21 = vld [vmem:[%s1862_s29 + $0x78] sm:$0xff]  ;;  %v511_v23 = vld [vmem:[%s1878_s11] sm:$0xff] }
  0x3d   : > { %v366_v20 = vld [vmem:[%s1862_s29 + $0x30] sm:$0xff]  ;;  %v367_v22 = vld [vmem:[%s1862_s29 + $0x38] sm:$0xff]  ;;  %vm515_vm1 = vnez %v511_v23  ;;  %v512_v44 = vld [vmem:[%s1878_s11 + $0x8] sm:$0xff] }
  0x3e   : > { %424 = vperm.xlu1 %1609, %v369_v9   ;;  %419 = vperm.xlu0 %1608, %v368_v10   ;;  %v513_v24 = vld [vmem:[%s1878_s11 + $0x10] sm:$0xff]  ;;  %v519_v25 = vsel %vm515_vm1, 16843009, %v1764_v8  ;;  %v514_v46 = vld [vmem:[%s1878_s11 + $0x18] sm:$0xff]  ;;  %vm516_vm5 = vnez %v512_v44  ;;  %v1953_v62 = vld [vmem:[%s307_s6] ss:$0 sm:$0xff] }
  0x3f   : > { %vm517_vm2 = vnez %v513_v24  ;;  %v523_v26 = vunpack.c.0.s8 %v519_v25  ;;  %v524_v28 = vunpack.c.1.s8 %v519_v25  ;;  %v525_v33 = vunpack.c.2.s8 %v519_v25 }
  0x40   : > { %v521_v27 = vsel %vm517_vm2, 16843009, %v1764_v8  ;;  %v526_v39 = vunpack.c.3.s8 %v519_v25  ;;  %vm518_vm7 = vnez %v514_v46  ;;  %v1940_v54 = vsel %vm516_vm5, 16843009, %v1764_v8 }
  0x41   : > { %v531_v29 = vunpack.c.0.s8 %v521_v27  ;;  %v539_v30 = vpack.c.b16 %v523_v26, %v523_v26  ;;  %v532_v31 = vunpack.c.1.s8 %v521_v27  ;;  %v541_v32 = vpack.c.b16 %v524_v28, %v524_v28 }
  0x42   : > { %429 = vperm.xlu1 %1609, %v370_v11   ;;  %389 = vperm.xlu0 %1608, %v362_v12   ;;  %v533_v34 = vunpack.c.2.s8 %v521_v27  ;;  %v543_v40 = vpack.c.b16 %v525_v33, %v525_v33  ;;  %v534_v43 = vunpack.c.3.s8 %v521_v27  ;;  %v545_v47 = vpack.c.b16 %v526_v39, %v526_v39 }
  0x43   : > { %v555_v35 = vpack.c.b16 %v531_v29, %v531_v29  ;;  %v540_v36 = vpack.c.b8 %v539_v30, %v539_v30  ;;  %v557_v37 = vpack.c.b16 %v532_v31, %v532_v31  ;;  %v542_v38 = vpack.c.b8 %v541_v32, %v541_v32 }
  0x44   : > { %v559_v41 = vpack.c.b16 %v533_v34, %v533_v34  ;;  %v544_v48 = vpack.c.b8 %v543_v40, %v543_v40  ;;  %v561_v51 = vpack.c.b16 %v534_v43, %v534_v43  ;;  %v546_v53 = vpack.c.b8 %v545_v47, %v545_v47 }
  0x45   : > { %v556_v42 = vpack.c.b8 %v555_v35, %v555_v35  ;;  %vm571_vm3 = vnez %v540_v36  ;;  %v558_v45 = vpack.c.b8 %v557_v37, %v557_v37  ;;  %vm572_vm4 = vnez %v542_v38  ;;  %v2142_v35 = vld [vmem:[#allocation2 + $0x48] sm:$0xff] }
  0x46   : > { %434 = vperm.xlu1 %1609, %v371_v13   ;;  %394 = vperm.xlu0 %1608, %v363_v14   ;;  %v560_v49 = vpack.c.b8 %v559_v41, %v559_v41  ;;  %v587_v50 = vsel %vm571_vm3, 16843009, %v1764_v8  ;;  %v588_v52 = vsel %vm572_vm4, 16843009, %v1764_v8  ;;  %vm573_vm9 = vnez %v544_v48 }
  0x47   : > { %vm579_vm6 = vnez %v556_v42  ;;  %vm580_vm8 = vnez %v558_v45  ;;  %v603_v55 = vunpack.c.0.s8 %v587_v50  ;;  %v1944_v57 = vsel %vm518_vm7, 16843009, %v1764_v8 }
  0x48   : > { %v595_v56 = vsel %vm579_vm6, 16843009, %v1764_v8  ;;  %v604_v58 = vunpack.c.0.s8 %v588_v52  ;;  %v596_v59 = vsel %vm580_vm8, 16843009, %v1764_v8  ;;  %vm581_vm10 = vnez %v560_v49 }
  0x49   : > { %v562_v60 = vpack.c.b8 %v561_v51, %v561_v51  ;;  %v527_v61 = vunpack.c.0.s8 %v1940_v54  ;;  %v611_v63 = vunpack.c.0.s8 %v595_v56  ;;  %vm574_vm11 = vnez %v546_v53 }
  0x4a   : > { %439 = vperm.xlu1 %1609, %v372_v15   ;;  %399 = vperm.xlu0 %1608, %v364_v16   ;;  %v535_v0 = vunpack.c.0.s8 %v1944_v57  ;;  %v612_v1 = vunpack.c.0.s8 %v596_v59  ;;  %v589_v2 = vsel %vm573_vm9, 16843009, %v1764_v8  ;;  %v597_v3 = vsel %vm581_vm10, 16843009, %v1764_v8 }
  0x4b   : > { %v528_v4 = vunpack.c.1.s8 %v1940_v54  ;;  %vm1959_vm12 = vcmp.ne.s32.totalorder %v603_v55, 0  ;;  %vm1963_vm13 = vcmp.ne.s32.totalorder %v604_v58, 0  ;;  %vm582_vm14 = vnez %v562_v60 }
  0x4c   : > { %v536_v10 = vunpack.c.1.s8 %v1944_v57  ;;  %v590_v13 = vsel %vm574_vm11, 16843009, %v1764_v8  ;;  %v547_v14 = vpack.c.b16 %v527_v61, %v527_v61  ;;  %vm1971_vm15 = vcmp.ne.s32.totalorder %v611_v63, 0 }
  0x4d   : > { %v605_v16 = vunpack.c.0.s8 %v589_v2  ;;  %vm1975_vm0 = vcmp.ne.s32.totalorder %v612_v1, 0  ;;  %v549_v23 = vpack.c.b16 %v528_v4, %v528_v4  ;;  %v606_v26 = vunpack.c.0.s8 %v590_v13 }
  0x4e   : > { %444 = vperm.xlu1 %1609, %v373_v17   ;;  %404 = vperm.xlu0 %1608, %v365_v18   ;;  %v613_v17 = vunpack.c.0.s8 %v597_v3  ;;  %v563_v18 = vpack.c.b16 %v535_v0, %v535_v0  ;;  %v565_v27 = vpack.c.b16 %v536_v10, %v536_v10  ;;  %v529_v28 = vunpack.c.2.s8 %v1940_v54 }
  0x4f   : > { %v537_v29 = vunpack.c.2.s8 %v1944_v57  ;;  %v548_v33 = vpack.c.b8 %v547_v14, %v547_v14  ;;  %vm1984_vm1 = vcmp.ne.s32.totalorder %v605_v16, 0  ;;  %v550_v42 = vpack.c.b8 %v549_v23, %v549_v23 }
  0x50   : > { %v564_v37 = vpack.c.b8 %v563_v18, %v563_v18  ;;  %vm1992_vm2 = vcmp.ne.s32.totalorder %v613_v17, 0  ;;  %vm1997_vm3 = vcmp.ne.s32.totalorder %v606_v26, 0  ;;  %v566_v46 = vpack.c.b8 %v565_v27, %v565_v27 }
  0x51   : > { %v551_v47 = vpack.c.b16 %v529_v28, %v529_v28  ;;  %v2001_v48 = vpack.c.b16 %v537_v29, %v537_v29  ;;  %vm575_vm4 = vnez %v548_v33  ;;  %v530_v56 = vunpack.c.3.s8 %v1940_v54 }
  0x52   : > { %449 = vperm.xlu1 %1609, %v374_v19   ;;  %409 = vperm.xlu0 %1608, %v366_v20   ;;  %vm2009_vm5 = vnez %v564_v37  ;;  %vm576_vm7 = vnez %v550_v42  ;;  %v591_v1 = vsel %vm575_vm4, 16843009, %v1764_v8  ;;  %vm2025_vm8 = vnez %v566_v46 }
  0x53   : > { %v552_v2 = vpack.c.b8 %v551_v47, %v551_v47  ;;  %v538_v3 = vunpack.c.3.s8 %v1944_v57  ;;  %v599_v7 = vsel %vm2009_vm5, 16843009, %v1764_v8  ;;  %v607_v17 = vunpack.c.0.s8 %v591_v1 }
  0x54   : > { %v615_v18 = vunpack.c.0.s8 %v599_v7  ;;  %vm1084_vm5 = vcmask 7168  }
  0x55   : > { %vm2049_vm9 = vnez %v552_v2  ;;  %v569_v28 = vpack.c.b16 %v538_v3, %v538_v3  ;;  %vm623_vm10 = vcmp.ne.s32.totalorder %v607_v17, 0 }
  0x56   : > { %454 = vperm.xlu1 %1609, %v375_v21   ;;  %414 = vperm.xlu0 %1608, %v367_v22   ;;  %v598_v22 = vsel %vm582_vm14, 16843009, %v1764_v8  ;;  %vm2067_vm11 = vcmp.ne.s32.totalorder %v615_v18, 0  ;;  %v593_v37 = vsel %vm2049_vm9, 16843009, %v1764_v8 }
  0x57   : > { %v614_v36 = vunpack.c.0.s8 %v598_v22 }
  0x59   : > { %vm2018_vm6 = vcmp.ne.s32.totalorder %v614_v36, 0 }
  0xb9   : > { %v385_v5 = vpop.permute.xlu1 %384  ;;  %v380_v6 = vpop.permute.xlu0 %379 }
  0xba   : > { %v464_v11 = vadd.f32 %v1953_v62, %v385_v5  ;;  %v463_v12 = vadd.f32 %v1953_v62, %v380_v6 }
  0xbc   : > { %v480_v19 = vmul.f32 0.2, %v464_v11  ;;  %v479_v20 = vmul.f32 0.2, %v463_v12 }
  0xbd   : > { %v425_v24 = vpop.permute.xlu1 %424  ;;  %v420_v25 = vpop.permute.xlu0 %419 }
  0xbe   : > { %v472_v30 = vadd.f32 %v1953_v62, %v425_v24  ;;  %v471_v31 = vadd.f32 %v1953_v62, %v420_v25  ;;  %v495_v32 = vmax.f32 %v463_v12, %v479_v20  ;;  %v496_v34 = vmax.f32 %v464_v11, %v480_v19 }
  0xbf   : > { %v592_v11 = vsel %vm576_vm7, 16843009, %v1764_v8  ;;  %v553_v12 = vpack.c.b16 %v530_v56, %v530_v56  ;;  %v600_v19 = vsel %vm2025_vm8, 16843009, %v1764_v8  ;;  %v568_v24 = vpack.c.b8 %v2001_v48, %v2001_v48 }
  0xc0   : > { %v488_v38 = vmul.f32 0.2, %v472_v30  ;;  %v487_v39 = vmul.f32 0.2, %v471_v31  ;;  %v1990_v40 = vsel %vm1959_vm12, %v495_v32, -1e+30  ;;  %v608_v32 = vunpack.c.0.s8 %v592_v11 }
  0xc1   : > { %v430_v43 = vpop.permute.xlu1 %429  ;;  %667 = vmax.xlane.f32.xlu0 %v1990_v40  ;;  %v390_v44 = vpop.permute.xlu0 %389  ;;  %v2007_v52 = vsel %vm1963_vm13, %v496_v34, -1e+30  ;;  %v554_v27 = vpack.c.b8 %v553_v12, %v553_v12  ;;  %v616_v36 = vunpack.c.0.s8 %v600_v19  ;;  %vm585_vm12 = vnez %v568_v24 }
  0xc2   : > { %v473_v49 = vadd.f32 %v1953_v62, %v430_v43  ;;  %v465_v50 = vadd.f32 %v1953_v62, %v390_v44  ;;  %v503_v51 = vmax.f32 %v471_v31, %v487_v39  ;;  %v504_v53 = vmax.f32 %v472_v30, %v488_v38 }
  0xc3   : > { %vm578_vm13 = vnez %v554_v27  ;;  %v570_v44 = vpack.c.b8 %v569_v28, %v569_v28  ;;  %vm624_vm14 = vcmp.ne.s32.totalorder %v608_v32, 0  ;;  %v2127_v27 = vld [vmem:[#allocation2 + $0x8] sm:$0xff] }
  0xc4   : > { %v489_v58 = vmul.f32 0.2, %v473_v49  ;;  %v481_v59 = vmul.f32 0.2, %v465_v50  ;;  %v2016_v60 = vsel %vm1971_vm15, %v503_v51, -1e+30 }
  0xc5   : > { %v435_v63 = vpop.permute.xlu1 %434  ;;  %669 = vmax.xlane.f32.xlu0 %v2007_v52  ;;  %683 = vmax.xlane.f32.xlu1 %v2016_v60  ;;  %v395_v0 = vpop.permute.xlu0 %394  ;;  %v2037_v9 = vsel %vm1975_vm0, %v504_v53, -1e+30  ;;  %v601_v51 = vsel %vm585_vm12, 16843009, %v1764_v8  ;;  %vm2092_vm15 = vcmp.ne.s32.totalorder %v616_v36, 0  ;;  %vm586_vm0 = vnez %v570_v44  ;;  %v2160_v44 = vld [vmem:[#allocation2 + $0x18] sm:$0xff] }
  0xc6   : > { %v474_v4 = vadd.f32 %v1953_v62, %v435_v63  ;;  %v466_v5 = vadd.f32 %v1953_v62, %v395_v0  ;;  %v497_v6 = vmax.f32 %v465_v50, %v481_v59  ;;  %v505_v10 = vmax.f32 %v473_v49, %v489_v58 }
  0xc7   : > { %v609_v50 = vunpack.c.0.s8 %v593_v37  ;;  %v594_v58 = vsel %vm578_vm13, 16843009, %v1764_v8  ;;  %v602_v11 = vsel %vm586_vm0, 16843009, %v1764_v8 }
  0xc8   : > { %v490_v13 = vmul.f32 0.2, %v474_v4  ;;  %v482_v14 = vmul.f32 0.2, %v466_v5  ;;  %v2042_v57 = vsel %vm1984_vm1, %v497_v6, -1e+30  ;;  %v618_v17 = vunpack.c.0.s8 %v602_v11 }
  0xc9   : > { %v440_v15 = vpop.permute.xlu1 %439  ;;  %685 = vmax.xlane.f32.xlu0 %v2037_v9  ;;  %671 = vmax.xlane.f32.xlu1 %v2042_v57  ;;  %v400_v16 = vpop.permute.xlu0 %399  ;;  %v2059_v25 = vsel %vm1992_vm2, %v505_v10, -1e+30  ;;  %vm625_vm1 = vcmp.ne.s32.totalorder %v609_v50, 0 }
  0xca   : > { %v475_v21 = vadd.f32 %v1953_v62, %v440_v15  ;;  %v467_v22 = vadd.f32 %v1953_v62, %v400_v16  ;;  %v498_v23 = vmax.f32 %v466_v5, %v482_v14  ;;  %v506_v26 = vmax.f32 %v474_v4, %v490_v13 }
  0xcb   : > { %v617_v4 = vunpack.c.0.s8 %v601_v51  ;;  %v610_v5 = vunpack.c.0.s8 %v594_v58  ;;  %vm634_vm4 = vcmp.ne.s32.totalorder %v618_v17, 0 }
  0xcc   : > { %v491_v29 = vmul.f32 0.2, %v475_v21  ;;  %v483_v30 = vmul.f32 0.2, %v467_v22  ;;  %v2063_v31 = vsel %vm1997_vm3, %v498_v23, -1e+30 }
  0xcd   : > { %v445_v33 = vpop.permute.xlu1 %444  ;;  %687 = vmax.xlane.f32.xlu0 %v2059_v25  ;;  %673 = vmax.xlane.f32.xlu1 %v2063_v31  ;;  %v405_v34 = vpop.permute.xlu0 %404  ;;  %v2078_v42 = vsel %vm2018_vm6, %v506_v26, -1e+30  ;;  %vm633_vm2 = vcmp.ne.s32.totalorder %v617_v4, 0  ;;  %vm626_vm3 = vcmp.ne.s32.totalorder %v610_v5, 0  ;;  %v2125_v26 = vld [vmem:[#allocation2 + $0x40] sm:$0xff] }
  0xce   : > { %v476_v38 = vadd.f32 %v1953_v62, %v445_v33  ;;  %v468_v39 = vadd.f32 %v1953_v62, %v405_v34  ;;  %v499_v41 = vmax.f32 %v467_v22, %v483_v30  ;;  %v507_v43 = vmax.f32 %v475_v21, %v491_v29  ;;  %v2120_v22 = vld [vmem:[#allocation2] sm:$0xff]  ;;  %v2140_v34 = vld [vmem:[#allocation2 + $0x10] sm:$0xff] }
  0xcf   : > { %v1765_v21 = vmov 1.0|1.0   ;;  %v2202_v4 = vld [vmem:[#allocation2 + $0x60] sm:$0xff] }
  0xd0   : > { %v492_v45 = vmul.f32 0.2, %v476_v38  ;;  %v484_v46 = vmul.f32 0.2, %v468_v39  ;;  %v2080_v47 = vsel %vm623_vm10, %v499_v41, -1e+30  ;;  %1516 = vmatprep.subr.bf16.mxu0 %v1765_v21  ;;  %1532 = vmatprep.subr.bf16.mxu1 %v1765_v21 }
  0xd1   : > { %v450_v48 = vpop.permute.xlu1 %449  ;;  %689 = vmax.xlane.f32.xlu0 %v2078_v42  ;;  %675 = vmax.xlane.f32.xlu1 %v2080_v47  ;;  %v410_v49 = vpop.permute.xlu0 %409  ;;  %v2090_v59 = vsel %vm2067_vm11, %v507_v43, -1e+30 }
  0xd2   : > { %v477_v53 = vadd.f32 %v1953_v62, %v450_v48  ;;  %v469_v55 = vadd.f32 %v1953_v62, %v410_v49  ;;  %v500_v56 = vmax.f32 %v468_v39, %v484_v46  ;;  %v508_v61 = vmax.f32 %v476_v38, %v492_v45  ;;  %1517 = vmatpush3.bf16.msra.mxu0 %v1765_v21  ;;  %v2162_v45 = vld [vmem:[#allocation2 + $0x50] sm:$0xff] }
  0xd3   : > { %1540 = vmatpush3.bf16.msra.mxu1 %v1765_v21  ;;  %1518 = vmatprep.subr.bf16.mxu0 %v1765_v21 }
  0xd4   : > { %v493_v0 = vmul.f32 0.2, %v477_v53  ;;  %v485_v1 = vmul.f32 0.2, %v469_v55  ;;  %v2096_v54 = vsel %vm624_vm14, %v500_v56, -1e+30  ;;  %1533 = vmatprep.subr.bf16.mxu1 %v1765_v21 }
  0xd5   : > { %v455_v2 = vpop.permute.xlu1 %454  ;;  %691 = vmax.xlane.f32.xlu0 %v2090_v59  ;;  %677 = vmax.xlane.f32.xlu1 %v2096_v54  ;;  %v415_v3 = vpop.permute.xlu0 %414  ;;  %v2105_v12 = vsel %vm2092_vm15, %v508_v61, -1e+30  ;;  %v2182_v56 = vld [vmem:[#allocation2 + $0x58] sm:$0xff] }
  0xd6   : > { %v478_v6 = vadd.f32 %v1953_v62, %v455_v2  ;;  %v470_v7 = vadd.f32 %v1953_v62, %v415_v3  ;;  %v501_v10 = vmax.f32 %v469_v55, %v485_v1  ;;  %v509_v16 = vmax.f32 %v477_v53, %v493_v0  ;;  %1519 = vmatpush3.bf16.msra.mxu0 %v1765_v21  ;;  %v2180_v55 = vld [vmem:[#allocation2 + $0x20] sm:$0xff]  ;;  %v2200_v3 = vld [vmem:[#allocation2 + $0x28] sm:$0xff] }
  0xd7   : > { %1541 = vmatpush3.bf16.msra.mxu1 %v1765_v21  ;;  %1520 = vmatprep.subr.bf16.mxu0 %v1765_v21 }
  0xd8   : > { %v494_v13 = vmul.f32 0.2, %v478_v6  ;;  %v486_v14 = vmul.f32 0.2, %v470_v7  ;;  %v2107_v15 = vsel %vm625_vm1, %v501_v10, -1e+30  ;;  %1534 = vmatprep.subr.bf16.mxu1 %v1765_v21 }
  0xd9   : > { %693 = vmax.xlane.f32.xlu0 %v2105_v12  ;;  %679 = vmax.xlane.f32.xlu1 %v2107_v15  ;;  %v2111_v18 = vsel %vm633_vm2, %v509_v16, -1e+30  ;;  %v2222_v16 = vld [vmem:[#allocation2 + $0x68] sm:$0xff] }
  0xda   : > { %v502_v62 = vmax.f32 %v470_v7, %v486_v14  ;;  %v510_v19 = vmax.f32 %v478_v6, %v494_v13  ;;  %1521 = vmatpush3.bf16.msra.mxu0 %v1765_v21  ;;  %v2220_v14 = vld [vmem:[#allocation2 + $0x30] sm:$0xff] }
  0xdb   : > { %1542 = vmatpush3.bf16.msra.mxu1 %v1765_v21  ;;  %1522 = vmatprep.subr.bf16.mxu0 %v1765_v21 }
  0xdc   : > { %v2113_v8 = vsel %vm626_vm3, %v502_v62, -1e+30  ;;  %v2117_v20 = vsel %vm634_vm4, %v510_v19, -1e+30  ;;  %1535 = vmatprep.subr.bf16.mxu1 %v1765_v21 }
  0xdd   : > { %695 = vmax.xlane.f32.xlu0 %v2111_v18  ;;  %681 = vmax.xlane.f32.xlu1 %v2113_v8 }
  0xde   : > { %1523 = vmatpush3.bf16.msra.mxu0 %v1765_v21 }
  0xdf   : > { %1543 = vmatpush3.bf16.msra.mxu1 %v1765_v21  ;;  %1524 = vmatprep.subr.bf16.mxu0 %v1765_v21 }
  0xe0   : > { %1536 = vmatprep.subr.bf16.mxu1 %v1765_v21 }
  0xe1   : > { %697 = vmax.xlane.f32.xlu0 %v2117_v20 }
  0xe2   : > { %1525 = vmatpush3.bf16.msra.mxu0 %v1765_v21 }
  0xe3   : > { %1544 = vmatpush3.bf16.msra.mxu1 %v1765_v21  ;;  %1526 = vmatprep.subr.bf16.mxu0 %v1765_v21 }
  0xe4   : > { %1537 = vmatprep.subr.bf16.mxu1 %v1765_v21 }
  0xe6   : > { %1527 = vmatpush3.bf16.msra.mxu0 %v1765_v21 }
  0xe7   : > { %1545 = vmatpush3.bf16.msra.mxu1 %v1765_v21  ;;  %1528 = vmatprep.subr.bf16.mxu0 %v1765_v21 }
  0xe8   : > { %1538 = vmatprep.subr.bf16.mxu1 %v1765_v21 }
  0xea   : > { %1529 = vmatpush3.bf16.msra.mxu0 %v1765_v21 }
  0xeb   : > { %1546 = vmatpush3.bf16.msra.mxu1 %v1765_v21  ;;  %1530 = vmatprep.subr.bf16.mxu0 %v1765_v21 }
  0xec   : > { %1539 = vmatprep.subr.bf16.mxu1 %v1765_v21 }
  0xee   : > { %1531 = vmatpush3.bf16.msra.mxu0 %v1765_v21 }
  0xef   : > { %1547 = vmatpush3.bf16.msra.mxu1 %v1765_v21 }
 0x14e   : > { %v668_v23 = vpop.xlane.xlu0 %667 }
 0x14f   : > { %v2123_v24 = vmax.f32 %v2120_v22, %v668_v23 }
 0x151   : > { %v859_v28 = vsub.f32 %v2120_v22, %v2123_v24  ;;  %1101 = vst.msk [vmem:[#allocation2] sm:$0xff] %vm1084_vm5, %v2123_v24  ;;  %717 = vperm.xlu1 %1609, %v2123_v24  }
 0x152   : > { %v684_v29 = vpop.xlane.xlu1 %683  ;;  %v670_v30 = vpop.xlane.xlu0 %669 }
 0x153   : > { %v2135_v32 = vmax.f32 %v2125_v26, %v684_v29  ;;  %v2138_v33 = vmax.f32 %v2127_v27, %v670_v30  ;;  %v2240_v30 = vld [vmem:[#allocation2 + $0x38] sm:$0xff] }
 0x155   : > { %1109 = vst.msk [vmem:[#allocation2 + $0x40] sm:$0xff] %vm1084_vm5, %v2135_v32  ;;  %v860_v37 = vsub.f32 %v2127_v27, %v2138_v33  ;;  %1102 = vst.msk [vmem:[#allocation2 + $0x8] sm:$0xff] %vm1084_vm5, %v2138_v33  ;;  %757 = vperm.xlu0 %1608, %v2135_v32   ;;  %722 = vperm.xlu1 %1609, %v2138_v33  }
 0x156   : > { %v672_v38 = vpop.xlane.xlu1 %671  ;;  %v686_v39 = vpop.xlane.xlu0 %685 }
 0x157   : > { %v2155_v41 = vmax.f32 %v2140_v34, %v672_v38  ;;  %v2158_v43 = vmax.f32 %v2142_v35, %v686_v39  ;;  %v2242_v38 = vld [vmem:[#allocation2 + $0x70] sm:$0xff] }
 0x159   : > { %1103 = vst.msk [vmem:[#allocation2 + $0x10] sm:$0xff] %vm1084_vm5, %v2155_v41  ;;  %1110 = vst.msk [vmem:[#allocation2 + $0x48] sm:$0xff] %vm1084_vm5, %v2158_v43  ;;  %727 = vperm.xlu0 %1608, %v2155_v41   ;;  %762 = vperm.xlu1 %1609, %v2158_v43   ;;  %v2613_v22 = vsub.f32 %v2140_v34, %v2155_v41 }
 0x15a   : > { %v674_v49 = vpop.xlane.xlu1 %673  ;;  %v688_v50 = vpop.xlane.xlu0 %687 }
 0x15b   : > { %v2175_v51 = vmax.f32 %v2160_v44, %v674_v49  ;;  %v2178_v53 = vmax.f32 %v2162_v45, %v688_v50  ;;  %v879_v24 = vmul.f32 1.442695, %v2613_v22 }
 0x15d   : > { %1104 = vst.msk [vmem:[#allocation2 + $0x18] sm:$0xff] %vm1084_vm5, %v2175_v51  ;;  %1111 = vst.msk [vmem:[#allocation2 + $0x50] sm:$0xff] %vm1084_vm5, %v2178_v53  ;;  %732 = vperm.xlu0 %1608, %v2175_v51   ;;  %767 = vperm.xlu1 %1609, %v2178_v53   ;;  %v2612_v27 = vsub.f32 %v2160_v44, %v2175_v51 }
 0x15e   : > { %v676_v63 = vpop.xlane.xlu1 %675  ;;  %v690_v0 = vpop.xlane.xlu0 %689 }
 0x15f   : > { %v2195_v1 = vmax.f32 %v2180_v55, %v676_v63  ;;  %v2198_v2 = vmax.f32 %v2182_v56, %v690_v0  ;;  %v881_v33 = vmul.f32 1.442695, %v2612_v27 }
 0x161   : > { %1105 = vst.msk [vmem:[#allocation2 + $0x20] sm:$0xff] %vm1084_vm5, %v2195_v1  ;;  %1112 = vst.msk [vmem:[#allocation2 + $0x58] sm:$0xff] %vm1084_vm5, %v2198_v2  ;;  %737 = vperm.xlu0 %1608, %v2195_v1   ;;  %772 = vperm.xlu1 %1609, %v2198_v2  }
 0x162   : > { %v678_v7 = vpop.xlane.xlu1 %677  ;;  %v692_v10 = vpop.xlane.xlu0 %691 }
 0x163   : > { %v2215_v11 = vmax.f32 %v2200_v3, %v678_v7  ;;  %v2218_v13 = vmax.f32 %v2202_v4, %v692_v10  ;;  %v2260_v10 = vld [vmem:[#allocation2 + $0x78] sm:$0xff] }
 0x165   : > { %1106 = vst.msk [vmem:[#allocation2 + $0x28] sm:$0xff] %vm1084_vm5, %v2215_v11  ;;  %1113 = vst.msk [vmem:[#allocation2 + $0x60] sm:$0xff] %vm1084_vm5, %v2218_v13  ;;  %742 = vperm.xlu0 %1608, %v2215_v11   ;;  %777 = vperm.xlu1 %1609, %v2218_v13   ;;  %v2616_v34 = vsub.f32 %v2200_v3, %v2215_v11  ;;  %v2619_v3 = vsub.f32 %v2202_v4, %v2218_v13 }
 0x166   : > { %v680_v19 = vpop.xlane.xlu1 %679  ;;  %v694_v21 = vpop.xlane.xlu0 %693 }
 0x167   : > { %v2235_v23 = vmax.f32 %v2220_v14, %v680_v19  ;;  %v2238_v29 = vmax.f32 %v2222_v16, %v694_v21  ;;  %v885_v41 = vmul.f32 1.442695, %v2616_v34  ;;  %v899_v11 = vmul.f32 1.442695, %v2619_v3 }
 0x169   : > { %1107 = vst.msk [vmem:[#allocation2 + $0x30] sm:$0xff] %vm1084_vm5, %v2235_v23  ;;  %1114 = vst.msk [vmem:[#allocation2 + $0x68] sm:$0xff] %vm1084_vm5, %v2238_v29  ;;  %747 = vperm.xlu0 %1608, %v2235_v23   ;;  %782 = vperm.xlu1 %1609, %v2238_v29  }
 0x16a   : > { %v682_v50 = vpop.xlane.xlu1 %681  ;;  %v696_v63 = vpop.xlane.xlu0 %695 }
 0x16b   : > { %v2255_v0 = vmax.f32 %v2240_v30, %v682_v50  ;;  %v2258_v7 = vmax.f32 %v2242_v38, %v696_v63 }
 0x16d   : > { %1108 = vst.msk [vmem:[#allocation2 + $0x38] sm:$0xff] %vm1084_vm5, %v2255_v0  ;;  %1115 = vst.msk [vmem:[#allocation2 + $0x70] sm:$0xff] %vm1084_vm5, %v2258_v7  ;;  %752 = vperm.xlu0 %1608, %v2255_v0   ;;  %787 = vperm.xlu1 %1609, %v2258_v7   ;;  %v2620_v4 = vsub.f32 %v2240_v30, %v2255_v0 }
 0x16e   : > { %v698_v50 = vpop.xlane.xlu0 %697 }
 0x16f   : > { %v2273_v63 = vmax.f32 %v2260_v10, %v698_v50  ;;  %v889_v13 = vmul.f32 1.442695, %v2620_v4 }
 0x171   : > { %1116 = vst.msk [vmem:[#allocation2 + $0x78] sm:$0xff] %vm1084_vm5, %v2273_v63  ;;  %792 = vperm.xlu1 %1609, %v2273_v63  }
 0x1d0   : > { %v718_v21 = vpop.permute.xlu1 %717 }
 0x1d1   : > { %v795_v19 = vsub.f32 %v1990_v40, %v718_v21 }
 0x1d3   : > { %v811_v62 = vmul.f32 1.442695, %v795_v19 }
 0x1d4   : > { %v723_v49 = vpop.permute.xlu1 %722  ;;  %v758_v5 = vpop.permute.xlu0 %757 }
 0x1d5   : > { %1610 = vpow2.f32 %v811_v62  ;;  %v796_v17 = vsub.f32 %v2007_v52, %v723_v49  ;;  %v803_v50 = vsub.f32 %v2016_v60, %v758_v5 }
 0x1d7   : > { %v813_v61 = vmul.f32 1.442695, %v796_v17  ;;  %v827_v6 = vmul.f32 1.442695, %v803_v50 }
 0x1d8   : > { %v763_v46 = vpop.permute.xlu1 %762  ;;  %v728_v39 = vpop.permute.xlu0 %727 }
 0x1d9   : > { %1612 = vpow2.f32 %v813_v61  ;;  %v804_v58 = vsub.f32 %v2037_v9, %v763_v46  ;;  %v797_v36 = vsub.f32 %v2042_v57, %v728_v39 }
 0x1da   : > { %1614 = vpow2.f32 %v827_v6 }
 0x1db   : > { %v829_v48 = vmul.f32 1.442695, %v804_v58  ;;  %v815_v40 = vmul.f32 1.442695, %v797_v36 }
 0x1dc   : > { %v768_v19 = vpop.permute.xlu1 %767  ;;  %v733_v21 = vpop.permute.xlu0 %732 }
 0x1dd   : > { %1616 = vpow2.f32 %v829_v48  ;;  %v805_v62 = vsub.f32 %v2059_v25, %v768_v19  ;;  %v798_v52 = vsub.f32 %v2063_v31, %v733_v21 }
 0x1de   : > { %1618 = vpow2.f32 %v815_v40 }
 0x1df   : > { %v1611_v60 = vpop.eup %1610  ;;  %v831_v5 = vmul.f32 1.442695, %v805_v62  ;;  %v817_v17 = vmul.f32 1.442695, %v798_v52 }
 0x1e0   : > { %1492 = vmatprep.mubr.f32.mxu0 %v1611_v60  ;;  %v773_v61 = vpop.permute.xlu1 %772  ;;  %v738_v49 = vpop.permute.xlu0 %737 }
 0x1e1   : > { %1620 = vpow2.f32 %v831_v5  ;;  %v806_v9 = vsub.f32 %v2078_v42, %v773_v61  ;;  %v799_v57 = vsub.f32 %v2080_v47, %v738_v49 }
 0x1e2   : > { %1622 = vpow2.f32 %v817_v17 }
 0x1e3   : > { %v1613_v36 = vpop.eup %1612  ;;  %v833_v46 = vmul.f32 1.442695, %v806_v9  ;;  %v819_v48 = vmul.f32 1.442695, %v799_v57 }
 0x1e4   : > { %v1615_v58 = vpop.eup %1614  ;;  %1493 = vmatmul.mubr.f32.vlgmr.msra.gmra.mrb[0].mxu0 %v1613_v36  ;;  %v778_v25 = vpop.permute.xlu1 %777 }
 0x1e5   : > { %v743_v31 = vpop.permute.xlu0 %742  ;;  %1624 = vpow2.f32 %v833_v46  ;;  %v807_v6 = vsub.f32 %v2090_v59, %v778_v25  ;;  %1504 = vmatprep.mubr.f32.mxu1 %v1615_v58 }
 0x1e6   : > { %v800_v39 = vsub.f32 %v2096_v54, %v743_v31  ;;  %1626 = vpow2.f32 %v819_v48 }
 0x1e7   : > { %v1617_v50 = vpop.eup %1616  ;;  %v835_v40 = vmul.f32 1.442695, %v807_v6 }
 0x1e8   : > { %v821_v42 = vmul.f32 1.442695, %v800_v39  ;;  %v1619_v19 = vpop.eup %1618  ;;  %v783_v47 = vpop.permute.xlu1 %782  ;;  %1505 = vmatmul.mubr.f32.vlgmr.msra.gmra.mrb[0].mxu1 %v1617_v50 }
 0x1e9   : > { %v748_v21 = vpop.permute.xlu0 %747  ;;  %1628 = vpow2.f32 %v835_v40  ;;  %v808_v62 = vsub.f32 %v2105_v12, %v783_v47  ;;  %1495 = vmatprep.mubr.f32.mxu0 %v1619_v19  ;;  %v875_v40 = vmul.f32 1.442695, %v859_v28  ;;  %v2611_v47 = vsub.f32 %v2125_v26, %v2135_v32 }
 0x1ea   : > { %v801_v52 = vsub.f32 %v2107_v15, %v748_v21  ;;  %1630 = vpow2.f32 %v821_v42  ;;  %v2610_v42 = vsub.f32 %v2142_v35, %v2158_v43  ;;  %v2614_v28 = vsub.f32 %v2182_v56, %v2198_v2  ;;  %v844_v43 = vld [vmem:[#allocation3 + $0x8] sm:$0xff] }
 0x1eb   : > { %v1621_v60 = vpop.eup %1620  ;;  %v837_v59 = vmul.f32 1.442695, %v808_v62  ;;  %v891_v21 = vmul.f32 1.442695, %v2611_v47  ;;  %v2617_v56 = vsub.f32 %v2180_v55, %v2195_v1 }
 0x1ec   : > { %v823_v5 = vmul.f32 1.442695, %v801_v52  ;;  %v1623_v17 = vpop.eup %1622  ;;  %v788_v54 = vpop.permute.xlu1 %787  ;;  %1507 = vmatprep.mubr.f32.mxu1 %v1621_v60  ;;  %v893_v19 = vmul.f32 1.442695, %v2610_v42  ;;  %v897_v35 = vmul.f32 1.442695, %v2614_v28 }
 0x1ed   : > { %v753_v61 = vpop.permute.xlu0 %752  ;;  %1632 = vpow2.f32 %v837_v59  ;;  %v809_v49 = vsub.f32 %v2111_v18, %v788_v54  ;;  %1496 = vmatmul.mubr.f32.gmra.mrb[2].mxu0 %v1623_v17  ;;  %v843_v52 = vld [vmem:[#allocation3] sm:$0xff]  ;;  %v883_v2 = vmul.f32 1.442695, %v2617_v56 }
 0x1ee   : > { %v802_v9 = vsub.f32 %v2113_v8, %v753_v61  ;;  %1634 = vpow2.f32 %v823_v5  ;;  %v851_v54 = vld [vmem:[#allocation3 + $0x40] sm:$0xff]  ;;  %v2618_v61 = vsub.f32 %v2222_v16, %v2238_v29 }
 0x1ef   : > { %v1625_v57 = vpop.eup %1624  ;;  %v839_v12 = vmul.f32 1.442695, %v809_v49 }
 0x1f0   : > { %v825_v36 = vmul.f32 1.442695, %v802_v9  ;;  %v1627_v46 = vpop.eup %1626  ;;  %v793_v15 = vpop.permute.xlu1 %792  ;;  %1508 = vmatmul.mubr.f32.gmra.mrb[2].mxu1 %v1625_v57  ;;  %v901_v49 = vmul.f32 1.442695, %v2618_v61 }
 0x1f1   : > { %1636 = vpow2.f32 %v839_v12  ;;  %v810_v48 = vsub.f32 %v2117_v20, %v793_v15  ;;  %1498 = vmatprep.mubr.f32.mxu0 %v1627_v46  ;;  %v877_v20 = vmul.f32 1.442695, %v860_v37  ;;  %v2615_v37 = vsub.f32 %v2162_v45, %v2178_v53  ;;  %v852_v53 = vld [vmem:[#allocation3 + $0x48] sm:$0xff]  ;;  %v846_v15 = vld [vmem:[#allocation3 + $0x18] sm:$0xff] }
 0x1f2   : > { %1638 = vpow2.f32 %v825_v36 }
 0x1f3   : > { %v1629_v58 = vpop.eup %1628  ;;  %v841_v25 = vmul.f32 1.442695, %v810_v48  ;;  %v895_v26 = vmul.f32 1.442695, %v2615_v37  ;;  %v845_v48 = vld [vmem:[#allocation3 + $0x10] sm:$0xff]  ;;  %v856_v37 = vld [vmem:[#allocation3 + $0x68] sm:$0xff] }
 0x1f4   : > { %v1631_v31 = vpop.eup %1630  ;;  %1510 = vmatprep.mubr.f32.mxu1 %v1629_v58 }
 0x1f5   : > { %1640 = vpow2.f32 %v841_v25  ;;  %1499 = vmatmul.mubr.f32.gmra.mrb[4].mxu0 %v1631_v31  ;;  %v2621_v25 = vsub.f32 %v2220_v14, %v2235_v23 }
 0x1f6   : > { %1642 = vpow2.f32 %v877_v20  ;;  %v853_v20 = vld [vmem:[#allocation3 + $0x50] sm:$0xff] }
 0x1f7   : > { %v1633_v18 = vpop.eup %1632  ;;  %1644 = vpow2.f32 %v875_v40  ;;  %v887_v31 = vmul.f32 1.442695, %v2621_v25  ;;  %v2622_v40 = vsub.f32 %v2260_v10, %v2273_v63  ;;  %v848_v63 = vld [vmem:[#allocation3 + $0x28] sm:$0xff]  ;;  %v1121_v25 = vld [vmem:[#allocation2] sm:$0xff] (!%p1424_p13) }
 0x1f8   : > { %v1635_v8 = vpop.eup %1634  ;;  %1511 = vmatmul.mubr.f32.gmra.mrb[4].mxu1 %v1633_v18  ;;  %1646 = vpow2.f32 %v893_v19  ;;  %v2623_v19 = vsub.f32 %v2242_v38, %v2258_v7  ;;  %vm1233_vm6 = vcmp.gt.f32.partialorder (!%p1424_p13), %v1121_v25, -1e+20 }
 0x1f9   : > { %1501 = vmatprep.mubr.f32.mxu0 %v1635_v8  ;;  %1648 = vpow2.f32 %v891_v21  ;;  %v854_v8 = vld [vmem:[#allocation3 + $0x58] sm:$0xff]  ;;  %v905_v30 = vmul.f32 1.442695, %v2622_v40 }
 0x1fa   : > { %1650 = vpow2.f32 %v881_v33  ;;  %v903_v14 = vmul.f32 1.442695, %v2623_v19  ;;  %v2369_v19 = vld [vmem:[#allocation2 + $0x28] sm:$0xff] (!%p1424_p13) }
 0x1fb   : > { %v1637_v6 = vpop.eup %1636  ;;  %1652 = vpow2.f32 %v879_v24  ;;  %vm1238_vm15 = vcmp.gt.f32.partialorder (!%p1424_p13), %v2369_v19, -1e+20 }
 0x1fc   : > { %v1639_v39 = vpop.eup %1638  ;;  %1513 = vmatprep.mubr.f32.mxu1 %v1637_v6  ;;  %1654 = vpow2.f32 %v897_v35  ;;  %v847_v35 = vld [vmem:[#allocation3 + $0x20] sm:$0xff] }
 0x1fd   : > { %1502 = vmatmul.mubr.f32.gmra.mrb[6].mxu0 %v1639_v39  ;;  %1656 = vpow2.f32 %v895_v26 }
 0x1fe   : > { %1658 = vpow2.f32 %v885_v41 }
 0x1ff   : > { %v1641_v50 = vpop.eup %1640  ;;  %1660 = vpow2.f32 %v883_v2 }
 0x200   : > { %1514 = vmatmul.mubr.f32.gmra.mrb[6].mxu1 %v1641_v50  ;;  %v1643_v32 = vpop.eup %1642  ;;  %1662 = vpow2.f32 %v901_v49  ;;  %v858_v49 = vld [vmem:[#allocation3 + $0x78] sm:$0xff] }
 0x201   : > { %v1645_v62 = vpop.eup %1644  ;;  %v908_v44 = vmul.f32 %v1643_v32, %v844_v43  ;;  %1664 = vpow2.f32 %v899_v11 }
 0x202   : > { %v1647_v51 = vpop.eup %1646  ;;  %v907_v45 = vmul.f32 %v1645_v62, %v843_v52  ;;  %1666 = vpow2.f32 %v889_v13  ;;  %v855_v62 = vld [vmem:[#allocation3 + $0x60] sm:$0xff] }
 0x203   : > { %v1649_v59 = vpop.eup %1648  ;;  %v916_v55 = vmul.f32 %v1647_v51, %v852_v53  ;;  %1668 = vpow2.f32 %v887_v31  ;;  %v850_v53 = vld [vmem:[#allocation3 + $0x38] sm:$0xff]  ;;  %v1201_v31 = vld [vmem:[%s1871_s18] sm:$0xff] (!%p1424_p13) }
 0x204   : > { %v915_v57 = vmul.f32 %v1649_v59, %v851_v54  ;;  %v1651_v12 = vpop.eup %1650  ;;  %1670 = vpow2.f32 %v905_v30  ;;  %v2364_v30 = vld [vmem:[#allocation2 + $0x18] sm:$0xff] (!%p1424_p13)  ;;  %vm1217_vm7 = vcmp.gt.f32.partialorder (!%p1424_p13), %v1201_v31, 0.0 }
 0x205   : > { %v1653_v16 = vpop.eup %1652  ;;  %v910_v18 = vmul.f32 %v1651_v12, %v846_v15  ;;  %1672 = vpow2.f32 %v903_v14  ;;  %vm1236_vm13 = vcmp.gt.f32.partialorder (!%p1424_p13), %v2364_v30, -1e+20  ;;  %vm2390_vm1 = vmand (!%p1424_p13), %vm1217_vm7, %vm1233_vm6 }
 0x206   : > { %v1655_v58 = vpop.eup %1654  ;;  %v909_v50 = vmul.f32 %v1653_v16, %v845_v48 }
 0x207   : > { %v1657_v6 = vpop.eup %1656  ;;  %v918_v47 = vmul.f32 %v1655_v58, %v854_v8  ;;  %v1122_v8 = vld [vmem:[#allocation2 + $0x8] sm:$0xff] (!%p1424_p13) }
 0x208   : > { %v917_v27 = vmul.f32 %v1657_v6, %v853_v20  ;;  %v1659_v33 = vpop.eup %1658  ;;  %v1202_v6 = vld [vmem:[%s1871_s18 + $0x8] sm:$0xff] (!%p1424_p13)  ;;  %v1203_v20 = vld [vmem:[%s1871_s18 + $0x10] sm:$0xff] (!%p1424_p13)  ;;  %vm1234_vm8 = vcmp.gt.f32.partialorder (!%p1424_p13), %v1122_v8, -1e+20 }
 0x209   : > { %v1661_v24 = vpop.eup %1660  ;;  %v912_v7 = vmul.f32 %v1659_v33, %v848_v63  ;;  %vm1218_vm9 = vcmp.gt.f32.partialorder (!%p1424_p13), %v1202_v6, 0.0  ;;  %vm1219_vm10 = vcmp.gt.f32.partialorder (!%p1424_p13), %v1203_v20, 0.0  ;;  %v2381_v63 = vld [vmem:[#allocation2 + $0x38] sm:$0xff] (!%p1424_p13) }
 0x20a   : > { %v1663_v38 = vpop.eup %1662  ;;  %v911_v43 = vmul.f32 %v1661_v24, %v847_v35  ;;  %v2384_v35 = vld [vmem:[%s1871_s18 + $0x38] sm:$0xff] (!%p1424_p13)  ;;  %vm2397_vm4 = vmand (!%p1424_p13), %vm1218_vm9, %vm1234_vm8  ;;  %vm1240_vm6 = vcmp.gt.f32.partialorder (!%p1424_p13), %v2381_v63, -1e+20 }
 0x20b   : > { %v1665_v26 = vpop.eup %1664  ;;  %vm1224_vm9 = vcmp.gt.f32.partialorder (!%p1424_p13), %v2384_v35, 0.0 }
 0x20c   : > { %v919_v56 = vmul.f32 %v1665_v26, %v855_v62  ;;  %v1667_v2 = vpop.eup %1666 }
 0x20d   : > { %v1669_v59 = vpop.eup %1668  ;;  %v914_v61 = vmul.f32 %v1667_v2, %v850_v53  ;;  %v2412_v2 = vld [vmem:[#allocation2 + $0x48] sm:$0xff] (!%p1424_p13) }
 0x20e   : > { %v1671_v54 = vpop.eup %1670 }
 0x2b7   : > { %v1494_v60 = vpop.f32.mrb[0].mxu0 }
 0x2b8   : > { %v1069_v5 = vadd.f32 %v1494_v60, %v908_v44  ;;  %v989_v17 = vpop.f32.mrb[1].mxu0  ;;  %v920_v44 = vmul.f32 %v1663_v38, %v856_v37  ;;  %v2386_v38 = vld [vmem:[#allocation2 + $0x40] sm:$0xff] (!%p1424_p13) }
 0x2b9   : > { %v1068_v9 = vadd.f32 %v989_v17, %v907_v45  ;;  %v849_v17 = vld [vmem:[#allocation3 + $0x30] sm:$0xff]  ;;  %vm1241_vm3 = vcmp.gt.f32.partialorder (!%p1424_p13), %v2386_v38, -1e+20 }
 0x2ba   : > { %1086 = vst.msk [vmem:[#allocation3 + $0x8] sm:$0xff] %vm1084_vm5, %v1069_v5  ;;  %v913_v11 = vmul.f32 %v1669_v59, %v849_v17  ;;  %v1210_v17 = vld [vmem:[%s1871_s18 + $0x48] sm:$0xff] (!%p1424_p13) }
 0x2bb   : > { %1085 = vst.msk [vmem:[#allocation3] sm:$0xff] %vm1084_vm5, %v1068_v9  ;;  %v1506_v1 = vpop.f32.mrb[0].mxu1  ;;  %v1673_v9 = vpop.eup %1672 }
 0x2bc   : > { %v1077_v36 = vadd.f32 %v1506_v1, %v916_v55  ;;  %v1029_v46 = vpop.f32.mrb[1].mxu1  ;;  %v857_v55 = vld [vmem:[#allocation3 + $0x70] sm:$0xff] }
 0x2bd   : > { %v1076_v29 = vadd.f32 %v1029_v46, %v915_v57  ;;  %v921_v15 = vmul.f32 %v1673_v9, %v857_v55 }
 0x2be   : > { %1094 = vst.msk [vmem:[#allocation3 + $0x48] sm:$0xff] %vm1084_vm5, %v1077_v36  ;;  %v922_v36 = vmul.f32 %v1671_v54, %v858_v49 }
 0x2bf   : > { %1093 = vst.msk [vmem:[#allocation3 + $0x40] sm:$0xff] %vm1084_vm5, %v1076_v29 }
 0x2c0   : > { %v1497_v39 = vpop.f32.mrb[2].mxu0 }
 0x2c1   : > { %v1071_v0 = vadd.f32 %v1497_v39, %v910_v18  ;;  %v999_v42 = vpop.f32.mrb[3].mxu0  ;;  %v1138_v13 = vld [vmem:[#allocation3 + $0x8] sm:$0xff] (!%p1424_p13) }
 0x2c2   : > { %v1070_v23 = vadd.f32 %v999_v42, %v909_v50  ;;  %v1137_v4 = vld [vmem:[#allocation3] sm:$0xff] (!%p1424_p13)  ;;  %v1123_v50 = vld [vmem:[#allocation2 + $0x10] sm:$0xff] (!%p1424_p13) }
 0x2c3   : > { %1088 = vst.msk [vmem:[#allocation3 + $0x18] sm:$0xff] %vm1084_vm5, %v1071_v0  ;;  %v1509_v21 = vpop.f32.mrb[2].mxu1  ;;  %1674 = vlog2.f32 (!%p1424_p13), %v1137_v4  ;;  %v1204_v0 = vld [vmem:[%s1871_s18 + $0x18] sm:$0xff] (!%p1424_p13)  ;;  %v2367_v42 = vld [vmem:[#allocation2 + $0x20] sm:$0xff] (!%p1424_p13)  ;;  %vm1235_vm11 = vcmp.gt.f32.partialorder (!%p1424_p13), %v1123_v50, -1e+20 }
 0x2c4   : > { %1087 = vst.msk [vmem:[#allocation3 + $0x10] sm:$0xff] %vm1084_vm5, %v1070_v23  ;;  %v1079_v22 = vadd.f32 %v1509_v21, %v918_v47  ;;  %v1039_v10 = vpop.f32.mrb[3].mxu1  ;;  %1676 = vlog2.f32 (!%p1424_p13), %v1138_v13  ;;  %v1205_v23 = vld [vmem:[%s1871_s18 + $0x20] sm:$0xff] (!%p1424_p13)  ;;  %vm1220_vm12 = vcmp.gt.f32.partialorder (!%p1424_p13), %v1204_v0, 0.0  ;;  %v1206_v21 = vld [vmem:[%s1871_s18 + $0x28] sm:$0xff] (!%p1424_p13)  ;;  %vm2405_vm7 = vmand (!%p1424_p13), %vm1219_vm10, %vm1235_vm11 }
 0x2c5   : > { %v1078_v28 = vadd.f32 %v1039_v10, %v917_v27  ;;  %v2374_v27 = vld [vmem:[#allocation2 + $0x30] sm:$0xff] (!%p1424_p13)  ;;  %vm1237_vm14 = vcmp.gt.f32.partialorder (!%p1424_p13), %v2367_v42, -1e+20  ;;  %vm1221_vm0 = vcmp.gt.f32.partialorder (!%p1424_p13), %v1205_v23, 0.0  ;;  %vm1222_vm2 = vcmp.gt.f32.partialorder (!%p1424_p13), %v1206_v21, 0.0  ;;  %vm2424_vm10 = vmand (!%p1424_p13), %vm1220_vm12, %vm1236_vm13  ;;  %v1212_v0 = vld [vmem:[%s1871_s18 + $0x58] sm:$0xff] (!%p1424_p13) }
 0x2c6   : > { %1096 = vst.msk [vmem:[#allocation3 + $0x58] sm:$0xff] %vm1084_vm5, %v1079_v22  ;;  %v1145_v33 = vld [vmem:[#allocation3 + $0x40] sm:$0xff] (!%p1424_p13)  ;;  %v2379_v10 = vld [vmem:[%s1871_s18 + $0x30] sm:$0xff] (!%p1424_p13)  ;;  %vm2446_vm12 = vmand (!%p1424_p13), %vm1222_vm2, %vm1238_vm15  ;;  %vm1226_vm13 = vcmp.gt.f32.partialorder (!%p1424_p13), %v1210_v17, 0.0  ;;  %vm2636_vm15 = vcmp.gt.f32.partialorder (!%p1424_p13), %v2374_v27, -1e+20 }
 0x2c7   : > { %1095 = vst.msk [vmem:[#allocation3 + $0x50] sm:$0xff] %vm1084_vm5, %v1078_v28  ;;  %vm1223_vm8 = vcmp.gt.f32.partialorder (!%p1424_p13), %v2379_v10, 0.0  ;;  %v1213_v21 = vld [vmem:[%s1871_s18 + $0x60] sm:$0xff] (!%p1424_p13) }
 0x2c8   : > { %v1500_v32 = vpop.f32.mrb[4].mxu0 }
 0x2c9   : > { %v1073_v52 = vadd.f32 %v1500_v32, %v912_v7  ;;  %v1009_v34 = vpop.f32.mrb[5].mxu0  ;;  %v1146_v7 = vld [vmem:[#allocation3 + $0x48] sm:$0xff] (!%p1424_p13) }
 0x2ca   : > { %v1072_v41 = vadd.f32 %v1009_v34, %v911_v43  ;;  %v1140_v18 = vld [vmem:[#allocation3 + $0x18] sm:$0xff] (!%p1424_p13) }
 0x2cb   : > { %1090 = vst.msk [vmem:[#allocation3 + $0x28] sm:$0xff] %vm1084_vm5, %v1073_v52  ;;  %v1512_v51 = vpop.f32.mrb[4].mxu1  ;;  %v1139_v58 = vld [vmem:[#allocation3 + $0x10] sm:$0xff] (!%p1424_p13) }
 0x2cc   : > { %1089 = vst.msk [vmem:[#allocation3 + $0x20] sm:$0xff] %vm1084_vm5, %v1072_v41  ;;  %v1081_v60 = vadd.f32 %v1512_v51, %v920_v44  ;;  %v1049_v45 = vpop.f32.mrb[5].mxu1  ;;  %1678 = vlog2.f32 (!%p1424_p13), %v1139_v58  ;;  %v1209_v41 = vld [vmem:[%s1871_s18 + $0x40] sm:$0xff] (!%p1424_p13) }
 0x2cd   : > { %v1080_v5 = vadd.f32 %v1049_v45, %v919_v56  ;;  %1680 = vlog2.f32 (!%p1424_p13), %v1140_v18  ;;  %v1675_v22 = vpop.eup (!%p1424_p13), %1674  ;;  %vm1225_vm11 = vcmp.gt.f32.partialorder (!%p1424_p13), %v1209_v41, 0.0  ;;  %v1215_v41 = vld [vmem:[%s1871_s18 + $0x70] sm:$0xff] (!%p1424_p13) }
 0x2ce   : > { %1098 = vst.msk [vmem:[#allocation3 + $0x68] sm:$0xff] %vm1084_vm5, %v1081_v60  ;;  %v1677_v24 = vpop.eup (!%p1424_p13), %1676  ;;  %v1154_v28 = vmul.f32 (!%p1424_p13), 0.6931472, %v1675_v22  ;;  %v1147_v43 = vld [vmem:[#allocation3 + $0x50] sm:$0xff] (!%p1424_p13)  ;;  %v1148_v60 = vld [vmem:[#allocation3 + $0x58] sm:$0xff] (!%p1424_p13) }
 0x2cf   : > { %1097 = vst.msk [vmem:[#allocation3 + $0x60] sm:$0xff] %vm1084_vm5, %v1080_v5  ;;  %v1156_v32 = vmul.f32 (!%p1424_p13), 0.6931472, %v1677_v24 }
 0x2d0   : > { %v1503_v3 = vpop.f32.mrb[6].mxu0  ;;  %v1185_v62 = vadd.f32 (!%p1424_p13), %v1154_v28, %v1121_v25  ;;  %v1132_v25 = vld [vmem:[#allocation2 + $0x58] sm:$0xff] (!%p1424_p13) }
 0x2d1   : > { %v1075_v1 = vadd.f32 %v1503_v3, %v914_v61  ;;  %v1019_v57 = vpop.f32.mrb[7].mxu0  ;;  %1120 = sbr.rel (%p1424_p13) target bundleno = 759 (0x2f7), region = 82  ;;  %v1186_v51 = vadd.f32 (!%p1424_p13), %v1156_v32, %v1122_v8 }
 0x2d2   : > { %v1074_v12 = vadd.f32 %v1019_v57, %v913_v11  ;;  %v1142_v40 = vld [vmem:[#allocation3 + $0x28] sm:$0xff] (!%p1424_p13)  ;;  %v1265_v53 = vsel (!%p1424_p13), %vm2390_vm1, %v1185_v62, 1e+30  ;;  %vm2436_vm1 = vmand (!%p1424_p13), %vm1221_vm0, %vm1237_vm14  ;;  %vm1242_vm14 = vcmp.gt.f32.partialorder (!%p1424_p13), %v2412_v2, -1e+20 }
 0x2d3   : > { %1092 = vst.msk [vmem:[#allocation3 + $0x38] sm:$0xff] %vm1084_vm5, %v1075_v1  ;;  %v1515_v46 = vpop.f32.mrb[6].mxu1  ;;  %v1141_v39 = vld [vmem:[#allocation3 + $0x20] sm:$0xff] (!%p1424_p13)  ;;  %1281 = vst.msk [vmem:[%s1876_s10] sm:$0xff] (!%p1424_p13), %vm1084_vm5, %v1265_v53  ;;  %v1266_v49 = vsel (!%p1424_p13), %vm2397_vm4, %v1186_v51, 1e+30 }
 0x2d4   : > { %1091 = vst.msk [vmem:[#allocation3 + $0x30] sm:$0xff] %vm1084_vm5, %v1074_v12  ;;  %v1083_v16 = vadd.f32 %v1515_v46, %v922_v36  ;;  %v1059_v29 = vpop.f32.mrb[7].mxu1  ;;  %1682 = vlog2.f32 (!%p1424_p13), %v1141_v39  ;;  %1282 = vst.msk [vmem:[%s1876_s10 + $0x8] sm:$0xff] (!%p1424_p13), %vm1084_vm5, %v1266_v49  ;;  %v1131_v12 = vld [vmem:[#allocation2 + $0x50] sm:$0xff] (!%p1424_p13) }
 0x2d5   : > { %v1082_v48 = vadd.f32 %v1059_v29, %v921_v15  ;;  %1684 = vlog2.f32 (!%p1424_p13), %v1142_v40  ;;  %v1150_v36 = vld [vmem:[#allocation3 + $0x68] sm:$0xff] (!%p1424_p13)  ;;  %v1211_v29 = vld [vmem:[%s1871_s18 + $0x50] sm:$0xff] (!%p1424_p13)  ;;  %vm2463_vm0 = vmand (!%p1424_p13), %vm1223_vm8, %vm2636_vm15  ;;  %vm1243_vm2 = vcmp.gt.f32.partialorder (!%p1424_p13), %v1131_v12, -1e+20  ;;  %vm1244_vm8 = vcmp.gt.f32.partialorder (!%p1424_p13), %v1132_v25, -1e+20 }
 0x2d6   : > { %1100 = vst.msk [vmem:[#allocation3 + $0x78] sm:$0xff] %vm1084_vm5, %v1083_v16  ;;  %v1679_v37 = vpop.eup (!%p1424_p13), %1678  ;;  %v1149_v54 = vld [vmem:[#allocation3 + $0x60] sm:$0xff] (!%p1424_p13)  ;;  %vm2476_vm4 = vmand (!%p1424_p13), %vm1224_vm9, %vm1240_vm6  ;;  %vm1227_vm6 = vcmp.gt.f32.partialorder (!%p1424_p13), %v1211_v29, 0.0  ;;  %vm1228_vm9 = vcmp.gt.f32.partialorder (!%p1424_p13), %v1212_v0, 0.0 }
 0x2d7   : > { %1099 = vst.msk [vmem:[#allocation3 + $0x70] sm:$0xff] %vm1084_vm5, %v1082_v48  ;;  %v1158_v34 = vmul.f32 (!%p1424_p13), 0.6931472, %v1679_v37  ;;  %v1681_v44 = vpop.eup (!%p1424_p13), %1680 }
 0x2d8   : > { %v1160_v5 = vmul.f32 0.6931472, %v1681_v44 }
 0x2d9   : > { %v1187_v59 = vadd.f32 %v1158_v34, %v1123_v50  ;;  %v1135_v34 = vld [vmem:[#allocation2 + $0x70] sm:$0xff] }
 0x2da   : > { %v1144_v47 = vld [vmem:[#allocation3 + $0x38] sm:$0xff]  ;;  %v1188_v55 = vadd.f32 %v1160_v5, %v2364_v30 }
 0x2db   : > { %v1143_v14 = vld [vmem:[#allocation3 + $0x30] sm:$0xff]  ;;  %v1267_v11 = vsel %vm2405_vm7, %v1187_v59, 1e+30  ;;  %vm2487_vm7 = vmand %vm1225_vm11, %vm1241_vm3  ;;  %vm1229_vm11 = vcmp.gt.f32.partialorder %v1213_v21, 0.0  ;;  %v1216_v5 = vld [vmem:[%s1871_s18 + $0x78] sm:$0xff] }
 0x2dc   : > { %1686 = vlog2.f32 %v1143_v14  ;;  %1283 = vst.msk [vmem:[%s1876_s10 + $0x10] sm:$0xff] %vm1084_vm5, %v1267_v11  ;;  %v1268_v4 = vsel %vm2424_vm10, %v1188_v55, 1e+30  ;;  %vm2502_vm3 = vmand %vm1226_vm13, %vm1242_vm14 }
 0x2dd   : > { %1688 = vlog2.f32 %v1144_v47  ;;  %1284 = vst.msk [vmem:[%s1876_s10 + $0x18] sm:$0xff] %vm1084_vm5, %v1268_v4  ;;  %v1133_v47 = vld [vmem:[#allocation2 + $0x60] sm:$0xff]  ;;  %vm2514_vm10 = vmand %vm1227_vm6, %vm1243_vm2  ;;  %vm1247_vm2 = vcmp.gt.f32.partialorder %v1135_v34, -1e+20  ;;  %vm1232_vm6 = vcmp.gt.f32.partialorder %v1216_v5, 0.0 }
 0x2de   : > { %1690 = vlog2.f32 %v1145_v33  ;;  %v1683_v45 = vpop.eup %1682  ;;  %v1151_v31 = vld [vmem:[#allocation3 + $0x70] sm:$0xff]  ;;  %vm2525_vm13 = vmand %vm1228_vm9, %vm1244_vm8 }
 0x2df   : > { %1692 = vlog2.f32 %v1146_v7  ;;  %v1685_v61 = vpop.eup %1684  ;;  %v1162_v3 = vmul.f32 0.6931472, %v1683_v45  ;;  %v1214_v7 = vld [vmem:[%s1871_s18 + $0x68] sm:$0xff] }
 0x2e0   : > { %1694 = vlog2.f32 %v1147_v43  ;;  %v1164_v57 = vmul.f32 0.6931472, %v1685_v61  ;;  %vm1230_vm14 = vcmp.gt.f32.partialorder %v1214_v7, 0.0 }
 0x2e1   : > { %1696 = vlog2.f32 %v1148_v60  ;;  %v1189_v15 = vadd.f32 %v1162_v3, %v2367_v42  ;;  %v1152_v42 = vld [vmem:[#allocation3 + $0x78] sm:$0xff] }
 0x2e2   : > { %1698 = vlog2.f32 %v1149_v54  ;;  %v1190_v13 = vadd.f32 %v1164_v57, %v2369_v19 }
 0x2e3   : > { %1700 = vlog2.f32 %v1150_v36  ;;  %v1269_v8 = vsel %vm2436_vm1, %v1189_v15, 1e+30  ;;  %vm1245_vm1 = vcmp.gt.f32.partialorder %v1133_v47, -1e+20 }
 0x2e4   : > { %1702 = vlog2.f32 %v1151_v31  ;;  %1285 = vst.msk [vmem:[%s1876_s10 + $0x20] sm:$0xff] %vm1084_vm5, %v1269_v8  ;;  %v1270_v50 = vsel %vm2446_vm12, %v1190_v13, 1e+30  ;;  %vm2535_vm15 = vmand %vm1229_vm11, %vm1245_vm1 }
 0x2e5   : > { %1286 = vst.msk [vmem:[%s1876_s10 + $0x28] sm:$0xff] %vm1084_vm5, %v1270_v50  ;;  %1704 = vlog2.f32 %v1152_v42 }
 0x2e6   : > { %v1687_v46 = vpop.eup %1686 }
 0x2e7   : > { %v1689_v48 = vpop.eup %1688  ;;  %v1166_v58 = vmul.f32 0.6931472, %v1687_v46 }
 0x2e8   : > { %v1691_v18 = vpop.eup %1690  ;;  %v1168_v39 = vmul.f32 0.6931472, %v1689_v48 }
 0x2e9   : > { %v1191_v20 = vadd.f32 %v1166_v58, %v2374_v27  ;;  %v1170_v30 = vmul.f32 0.6931472, %v1691_v18  ;;  %v1693_v19 = vpop.eup %1692 }
 0x2ea   : > { %v1192_v14 = vadd.f32 %v1168_v39, %v2381_v63  ;;  %v1695_v27 = vpop.eup %1694  ;;  %v1172_v10 = vmul.f32 0.6931472, %v1693_v19  ;;  %v1134_v63 = vld [vmem:[#allocation2 + $0x68] sm:$0xff] }
 0x2eb   : > { %v1271_v33 = vsel %vm2463_vm0, %v1191_v20, 1e+30  ;;  %v1193_v22 = vadd.f32 %v1170_v30, %v2386_v38  ;;  %v1174_v35 = vmul.f32 0.6931472, %v1695_v27  ;;  %v1697_v38 = vpop.eup %1696  ;;  %vm1246_vm12 = vcmp.gt.f32.partialorder %v1134_v63, -1e+20 }
 0x2ec   : > { %1287 = vst.msk [vmem:[%s1876_s10 + $0x30] sm:$0xff] %vm1084_vm5, %v1271_v33  ;;  %v1272_v24 = vsel %vm2476_vm4, %v1192_v14, 1e+30  ;;  %v1194_v26 = vadd.f32 %v1172_v10, %v2412_v2  ;;  %v1699_v43 = vpop.eup %1698  ;;  %v1176_v52 = vmul.f32 0.6931472, %v1697_v38  ;;  %v1136_v2 = vld [vmem:[#allocation2 + $0x78] sm:$0xff]  ;;  %vm1262_vm4 = vmand %vm1230_vm14, %vm1246_vm12 }
 0x2ed   : > { %1288 = vst.msk [vmem:[%s1876_s10 + $0x38] sm:$0xff] %vm1084_vm5, %v1272_v24  ;;  %v1273_v37 = vsel %vm2487_vm7, %v1193_v22, 1e+30  ;;  %v1195_v62 = vadd.f32 %v1174_v35, %v1131_v12  ;;  %v1178_v56 = vmul.f32 0.6931472, %v1699_v43  ;;  %v1701_v60 = vpop.eup %1700  ;;  %vm1231_vm0 = vcmp.gt.f32.partialorder %v1215_v41, 0.0 }
 0x2ee   : > { %1289 = vst.msk [vmem:[%s1876_s10 + $0x40] sm:$0xff] %vm1084_vm5, %v1273_v37  ;;  %v1274_v44 = vsel %vm2502_vm3, %v1194_v26, 1e+30  ;;  %v1196_v53 = vadd.f32 %v1176_v52, %v1132_v25  ;;  %v1180_v54 = vmul.f32 0.6931472, %v1701_v60  ;;  %v1703_v61 = vpop.eup %1702  ;;  %vm1263_vm8 = vmand %vm1231_vm0, %vm1247_vm2 }
 0x2ef   : > { %1290 = vst.msk [vmem:[%s1876_s10 + $0x48] sm:$0xff] %vm1084_vm5, %v1274_v44  ;;  %v1275_v45 = vsel %vm2514_vm10, %v1195_v62, 1e+30  ;;  %v1197_v17 = vadd.f32 %v1178_v56, %v1133_v47  ;;  %vm1248_vm7 = vcmp.gt.f32.partialorder %v1136_v2, -1e+20  ;;  %v1705_v55 = vpop.eup %1704 }
 0x2f0   : > { %1291 = vst.msk [vmem:[%s1876_s10 + $0x50] sm:$0xff] %vm1084_vm5, %v1275_v45  ;;  %v1276_v49 = vsel %vm2525_vm13, %v1196_v53, 1e+30  ;;  %v1198_v3 = vadd.f32 %v1180_v54, %v1134_v63  ;;  %v1182_v11 = vmul.f32 0.6931472, %v1703_v61  ;;  %vm1264_vm3 = vmand %vm1232_vm6, %vm1248_vm7 }
 0x2f1   : > { %1292 = vst.msk [vmem:[%s1876_s10 + $0x58] sm:$0xff] %vm1084_vm5, %v1276_v49  ;;  %v1277_v9 = vsel %vm2535_vm15, %v1197_v17, 1e+30  ;;  %v1184_v12 = vmul.f32 0.6931472, %v1705_v55 }
 0x2f2   : > { %1293 = vst.msk [vmem:[%s1876_s10 + $0x60] sm:$0xff] %vm1084_vm5, %v1277_v9  ;;  %v1278_v1 = vsel %vm1262_vm4, %v1198_v3, 1e+30  ;;  %v1199_v57 = vadd.f32 %v1182_v11, %v1135_v34 }
 0x2f3   : > { %1294 = vst.msk [vmem:[%s1876_s10 + $0x68] sm:$0xff] %vm1084_vm5, %v1278_v1  ;;  %v1200_v46 = vadd.f32 %v1184_v12, %v1136_v2 }
 0x2f4   : > { %v1279_v36 = vsel %vm1263_vm8, %v1199_v57, 1e+30 }
 0x2f5   : > { %1295 = vst.msk [vmem:[%s1876_s10 + $0x70] sm:$0xff] %vm1084_vm5, %v1279_v36  ;;  %v1280_v15 = vsel %vm1264_vm3, %v1200_v46, 1e+30 }
 0x2f6   : > { %1296 = vst.msk [vmem:[%s1876_s10 + $0x78] sm:$0xff] %vm1084_vm5, %v1280_v15 }
 0x2f7 PF: > { %s14_s21 = sadd.s32 1, %s1760_s21   ;;  %s2651_s15 = smov %s1740_s16 }
 0x2f8   : > { %p11_p0 = scmp.ge.s32.totalorder %s14_s21, 6   ;;  %s2652_s16 = smov %s1842_s28 }
 0x2f9   : > { %s2653_s17 = smov %s1752_s19  ;;  %s2654_s18 = smov %s1756_s20 }
 0x2fa   : > { %s2655_s19 = smov %s2658_s22  ;;  %s2656_s20 = smov %s2662_s23 }
 0x2fb   :  { %13 = sbr.rel (!%p11_p0) target bundleno = 4 (0x4), region = 126 }

</bundles_post_ra>
